<compile_context>
chip_gen: v7x
topology: tpu7x:2x2x1
jax: 0.10.0
libtpu: 0.0.40
codegen_flags: <defaults>
</compile_context>

<pallas_src>
import functools
import numpy as np
import jax
import jax.numpy as jnp
from jax.experimental import pallas as pl
from jax.experimental.pallas import tpu as pltpu

PAD = 128  # padded lane width: dim_featn / dim_feate / dim_hid / dim_out all pad to this
VMEM_SPEC = pl.BlockSpec(memory_space=pltpu.MemorySpace.VMEM)


# --------------------------------------------------------------------------
# Fused Pallas kernel: the entire SkipPFN forward in one call.
# --------------------------------------------------------------------------
def _skip_pfn_kernel(x_ref, ea_ref, gcol_ref, grow_ref, s_ref, a_ref,
                     w1_ref, b1_ref, w2_ref, b2_ref, wc_ref, bc_ref,
                     out_ref, *, K, n_gnn, L):
    f32, bf16 = jnp.float32, jnp.bfloat16
    x = x_ref[...]                             # (Np, PAD) f32  node features
    ea = ea_ref[...].astype(bf16)              # (Ep, PAD)      edge features
    gcol = gcol_ref[...]                       # (Ep, Np) bf16  one-hot gather (x_i = x[col])
    grow = grow_ref[...]                       # (Ep, Np) bf16  one-hot gather (x_j = x[row])
    s = s_ref[...]                             # (Np, Ep) bf16  one-hot scatter-add at col
    a = a_ref[...]                             # (Np, Np) bf16  sym-normalized adjacency (no self loops)

    for l in range(L):
        skip = l < L - 1                       # all but the last MPN are SkipMPN
        xb = x.astype(bf16)

        # ---- EdgeAggregation: message = MLP(cat([x_i, x_j, edge_attr])), aggr='add'
        x_i = jnp.dot(gcol, xb, preferred_element_type=f32).astype(bf16)
        x_j = jnp.dot(grow, xb, preferred_element_type=f32).astype(bf16)
        msg = jnp.concatenate([x_i, x_j, ea], axis=-1)                     # (Ep, 3*PAD) bf16
        h1 = jnp.dot(msg, w1_ref[l], preferred_element_type=f32) + b1_ref[l]
        h1 = jnp.maximum(h1, 0.0)
        m = jnp.dot(h1.astype(bf16), w2_ref[l], preferred_element_type=f32) + b2_ref[l]
        h = jnp.dot(s, m.astype(bf16), preferred_element_type=f32)         # (Np, PAD) f32

        # ---- TAGConv stack: one wide matmul per conv over [h, A h, ..., A^K h]
        for g in range(n_gnn):
            hops = [h]
            for _ in range(K):
                hops.append(jnp.dot(a, hops[-1].astype(bf16),
                                    preferred_element_type=f32))
            hwide = jnp.concatenate(hops, axis=-1).astype(bf16)            # (Np, (K+1)*PAD)
            h = jnp.dot(hwide, wc_ref[l, g], preferred_element_type=f32) + bc_ref[l, g]
            if g < n_gnn - 1:
                # TODO(synk): nn.Dropout created inside forward() is training-mode and
                # stochastic; modeled as identity here (dropout_rate treated as 0).
                h = jnp.maximum(h, 0.0)

        x = x + h if skip else h               # fused SkipMPN residual (free VPU epilogue)

    out_ref[...] = x                           # lane-dense (Np, 128) f32 store


def skip_pfn_forward(x_p, ea_p, gcol, grow, S, A, pp, *, K, n_gnn_layers, L):
    kern = functools.partial(_skip_pfn_kernel, K=K, n_gnn=n_gnn_layers, L=L)
    return pl.pallas_call(
        kern,
        out_shape=jax.ShapeDtypeStruct(x_p.shape, jnp.float32),
        in_specs=[VMEM_SPEC] * 12,
        out_specs=VMEM_SPEC,
    )(x_p, ea_p, gcol, grow, S, A,
      pp['w1'], pp['b1'], pp['w2'], pp['b2'], pp['wc'], pp['bc'])


# --------------------------------------------------------------------------
# Host-side graph preprocessing (glue, faithful to SkipPFN.undirect_graph)
# --------------------------------------------------------------------------
def undirect_graph(edge_index, edge_attr):
    src0, dst0 = int(edge_index[0, 0]), int(edge_index[1, 0])
    targets_of_dst0 = edge_index[1, edge_index[0, :] == dst0]
    directed = src0 not in set(targets_of_dst0.tolist())
    if directed:
        rev = np.stack([edge_index[1, :], edge_index[0, :]], axis=0)
        edge_index = np.concatenate([edge_index, rev], axis=1)
        ea_rev = np.concatenate(
            [-edge_attr[:, 0:1], edge_attr[:, 1:2], -edge_attr[:, 2:3], edge_attr[:, 3:]],
            axis=1)
        edge_attr = np.concatenate([edge_attr, ea_rev], axis=0)
    return edge_index, edge_attr


def _round_up(n, m):
    return (n + m - 1) // m * m


def build_dense_graph(edge_index, num_nodes):
    row, col = edge_index[0], edge_index[1]
    E = edge_index.shape[1]
    Np = _round_up(num_nodes, 8)
    Ep = _round_up(E, 8)
    deg = np.zeros(num_nodes, np.float32)
    np.add.at(deg, col, np.ones(E, np.float32))
    dinv = np.where(deg > 0, deg ** -0.5, 0.0).astype(np.float32)
    norm = dinv[row] * dinv[col]
    A = np.zeros((Np, Np), np.float32)
    np.add.at(A, (col, row), norm)               # A[dst, src] (TAGConv gcn_norm, no self loops)
    S = np.zeros((Np, Ep), np.float32)
    S[col, np.arange(E)] = 1.0                   # scatter-add at col
    Gcol = np.zeros((Ep, Np), np.float32)
    Gcol[np.arange(E), col] = 1.0                # x_i = x[col]
    Grow = np.zeros((Ep, Np), np.float32)
    Grow[np.arange(E), row] = 1.0                # x_j = x[row]
    return A, S, Grow, Gcol, Np, Ep


# --------------------------------------------------------------------------
# Parameters (deterministic synthetic init; PyTorch Linear (out,in) stored as (in,out))
# --------------------------------------------------------------------------
def init_params(key, dim_featn, dim_feate, dim_out, dim_hid, n_gnn_layers, K, L):
    params = []
    for l in range(L):
        mpn_out = dim_out if l == L - 1 else dim_featn
        key, k1, k2, k3, k4 = jax.random.split(key, 5)
        d_in = 2 * dim_featn + dim_feate
        ea = dict(
            w1=jax.random.normal(k1, (d_in, dim_hid), jnp.float32) / np.sqrt(d_in),
            b1=0.01 * jax.random.normal(k2, (1, dim_hid), jnp.float32),
            w2=jax.random.normal(k3, (dim_hid, dim_hid), jnp.float32) / np.sqrt(dim_hid),
            b2=0.01 * jax.random.normal(k4, (1, dim_hid), jnp.float32),
        )
        convs = []
        for g in range(n_gnn_layers):
            c_in = dim_hid
            c_out = dim_hid if g < n_gnn_layers - 1 else mpn_out
            key, kw, kb = jax.random.split(key, 3)
            convs.append(dict(
                w=jax.random.normal(kw, (K + 1, c_in, c_out), jnp.float32)
                  / np.sqrt(c_in * (K + 1)),
                b=0.01 * jax.random.normal(kb, (1, c_out), jnp.float32),
            ))
        params.append(dict(ea=ea, convs=convs))
    return params


def prepare_padded_params(params, dim_featn, dim_feate, dim_hid, K, n_gnn_layers, L):
    """Zero-pad every weight to PAD lanes (numerically transparent), reshape the
    TAGConv stack for the single wide matmul, cast MXU operands to bf16, and stack
    across layers/convs into uniform arrays indexable inside the kernel."""
    P = PAD
    w1s, b1s, w2s, b2s, wcs, bcs = [], [], [], [], [], []
    for l in range(L):
        p = params[l]
        w1 = p['ea']['w1']                                    # (2f+e, hid)
        w1_p = jnp.zeros((3 * P, P), jnp.float32)
        w1_p = w1_p.at[0:dim_featn, :dim_hid].set(w1[:dim_featn])                   # x_i block
        w1_p = w1_p.at[P:P + dim_featn, :dim_hid].set(w1[dim_featn:2 * dim_featn])  # x_j block
        w1_p = w1_p.at[2 * P:2 * P + dim_feate, :dim_hid].set(w1[2 * dim_featn:])   # edge block
        b1_p = jnp.zeros((1, P), jnp.float32).at[:, :dim_hid].set(p['ea']['b1'])
        w2_p = jnp.zeros((P, P), jnp.float32).at[:dim_hid, :dim_hid].set(p['ea']['w2'])
        b2_p = jnp.zeros((1, P), jnp.float32).at[:, :dim_hid].set(p['ea']['b2'])
        wc_l, bc_l = [], []
        for g in range(n_gnn_layers):
            w = p['convs'][g]['w']                            # (K+1, c_in, c_out)
            b = p['convs'][g]['b']                            # (1, c_out)
            c_in, c_out = w.shape[1], w.shape[2]
            w_p = jnp.zeros((K + 1, P, P), jnp.float32).at[:, :c_in, :c_out].set(w)
            wc_l.append(w_p.reshape((K + 1) * P, P))          # hop-k rows at [k*P, k*P+c_in)
            bc_l.append(jnp.zeros((1, P), jnp.float32).at[:, :c_out].set(b))
        w1s.append(w1_p); b1s.append(b1_p); w2s.append(w2_p); b2s.append(b2_p)
        wcs.append(jnp.stack(wc_l)); bcs.append(jnp.stack(bc_l))
    return dict(
        w1=jnp.stack(w1s).astype(jnp.bfloat16), b1=jnp.stack(b1s),
        w2=jnp.stack(w2s).astype(jnp.bfloat16), b2=jnp.stack(b2s),
        wc=jnp.stack(wcs).astype(jnp.bfloat16), bc=jnp.stack(bcs),
    )


# --------------------------------------------------------------------------
# Pure-JAX f32 reference (unpadded) for a loose numerical check
# --------------------------------------------------------------------------
def reference_forward(x, edge_attr, row, col, A, S, params, *, K, n_gnn, L):
    for l in range(L):
        p = params[l]
        skip = l < L - 1
        inp = x
        msg = jnp.concatenate([x[col], x[row], edge_attr], axis=-1)
        h1 = jnp.maximum(msg @ p['ea']['w1'] + p['ea']['b1'], 0.0)
        m = h1 @ p['ea']['w2'] + p['ea']['b2']
        h = S @ m
        for g in range(n_gnn):
            w = p['convs'][g]['w']; b = p['convs'][g]['b']
            out = h @ w[0]
            hk = h
            for k in range(1, K + 1):
                hk = A @ hk
                out = out + hk @ w[k]
            h = out + b
            if g < n_gnn - 1:
                h = jnp.maximum(h, 0.0)
        x = inp + h if skip else h
    return x


# --------------------------------------------------------------------------
if __name__ == "__main__":
    dim_featn, dim_feate, dim_out, dim_hid = 4, 4, 8, 16
    n_gnn_layers, K, dropout_rate, L = 2, 2, 0.0, 2
    num_nodes = 8

    key = jax.random.PRNGKey(0)
    kx, ke, kp = jax.random.split(key, 3)

    # small directed graph: ring + chords (12 directed edges -> 24 after undirecting)
    edge_index = np.array([[0, 1, 2, 3, 4, 5, 6, 7, 0, 2, 1, 3],
                           [1, 2, 3, 4, 5, 6, 7, 0, 4, 6, 5, 7]], dtype=np.int32)
    edge_attr_np = np.asarray(jax.random.normal(ke, (edge_index.shape[1], dim_feate)),
                              dtype=np.float32)

    ei_u, ea_u = undirect_graph(edge_index, edge_attr_np)
    E = ei_u.shape[1]
    A_np, S_np, Grow_np, Gcol_np, Np, Ep = build_dense_graph(ei_u, num_nodes)

    x_np = np.asarray(jax.random.normal(kx, (num_nodes, dim_featn)), np.float32)

    params = init_params(kp, dim_featn, dim_feate, dim_out, dim_hid,
                         n_gnn_layers, K, L)
    pp = prepare_padded_params(params, dim_featn, dim_feate, dim_hid, K,
                               n_gnn_layers, L)

    # lane-dense padded device inputs (zero padding is numerically transparent)
    x_p = jnp.zeros((Np, PAD), jnp.float32).at[:num_nodes, :dim_featn].set(x_np)
    ea_p = jnp.zeros((Ep, PAD), jnp.float32).at[:E, :dim_feate].set(ea_u)
    A = jnp.asarray(A_np, jnp.bfloat16)
    S = jnp.asarray(S_np, jnp.bfloat16)
    Grow = jnp.asarray(Grow_np, jnp.bfloat16)
    Gcol = jnp.asarray(Gcol_np, jnp.bfloat16)

    fwd = jax.jit(functools.partial(skip_pfn_forward, K=K,
                                    n_gnn_layers=n_gnn_layers, L=L))
    out_p = fwd(x_p, ea_p, Gcol, Grow, S, A, pp)
    jax.block_until_ready(out_p)
    out = np.asarray(out_p)[:num_nodes, :dim_out]

    # loose check against pure-f32 reference (kernel uses bf16 MXU operands)
    ref = reference_forward(jnp.asarray(x_np), jnp.asarray(ea_u),
                            jnp.asarray(ei_u[0]), jnp.asarray(ei_u[1]),
                            jnp.asarray(A_np[:num_nodes, :num_nodes]),
                            jnp.asarray(S_np[:num_nodes, :E]),
                            params, K=K, n_gnn=n_gnn_layers, L=L)
    assert out.shape == (num_nodes, dim_out) and out_p.dtype == jnp.float32
    assert np.allclose(out, np.asarray(ref), rtol=0.1, atol=0.1), \
        float(np.max(np.abs(out - np.asarray(ref))))
    print("KERNEL_OK")
</pallas_src>

<mosaic_0001>
module attributes {stable_mosaic.version = 11 : i64} {
  func.func @_skip_pfn_kernel(%arg0: memref<8x128xf32, #tpu.memory_space<vmem>>, %arg1: memref<24x128xf32, #tpu.memory_space<vmem>>, %arg2: memref<24x8xbf16, #tpu.memory_space<vmem>>, %arg3: memref<24x8xbf16, #tpu.memory_space<vmem>>, %arg4: memref<8x24xbf16, #tpu.memory_space<vmem>>, %arg5: memref<8x8xbf16, #tpu.memory_space<vmem>>, %arg6: memref<2x384x128xbf16, #tpu.memory_space<vmem>>, %arg7: memref<2x1x128xf32, #tpu.memory_space<vmem>>, %arg8: memref<2x128x128xbf16, #tpu.memory_space<vmem>>, %arg9: memref<2x1x128xf32, #tpu.memory_space<vmem>>, %arg10: memref<2x2x384x128xbf16, #tpu.memory_space<vmem>>, %arg11: memref<2x2x1x128xf32, #tpu.memory_space<vmem>>, %arg12: memref<8x128xf32, #tpu.memory_space<vmem>>) attributes {dimension_semantics = [], scalar_prefetch = 0 : i64, scratch_operands = 0 : i64, tpu.core_type = #tpu.core_type<tc>} {
    %c0 = arith.constant 0 : index
    %c0_0 = arith.constant 0 : index
    %0 = vector.load %arg0[%c0, %c0_0] : memref<8x128xf32, #tpu.memory_space<vmem>>, vector<8x128xf32>
    %c0_1 = arith.constant 0 : index
    %c0_2 = arith.constant 0 : index
    %1 = vector.load %arg1[%c0_1, %c0_2] : memref<24x128xf32, #tpu.memory_space<vmem>>, vector<24x128xf32>
    %2 = arith.truncf %1 : vector<24x128xf32> to vector<24x128xbf16>
    %c0_3 = arith.constant 0 : index
    %c0_4 = arith.constant 0 : index
    %3 = vector.load %arg2[%c0_3, %c0_4] : memref<24x8xbf16, #tpu.memory_space<vmem>>, vector<24x8xbf16>
    %c0_5 = arith.constant 0 : index
    %c0_6 = arith.constant 0 : index
    %4 = vector.load %arg3[%c0_5, %c0_6] : memref<24x8xbf16, #tpu.memory_space<vmem>>, vector<24x8xbf16>
    %c0_7 = arith.constant 0 : index
    %c0_8 = arith.constant 0 : index
    %5 = vector.load %arg4[%c0_7, %c0_8] : memref<8x24xbf16, #tpu.memory_space<vmem>>, vector<8x24xbf16>
    %c0_9 = arith.constant 0 : index
    %c0_10 = arith.constant 0 : index
    %6 = vector.load %arg5[%c0_9, %c0_10] : memref<8x8xbf16, #tpu.memory_space<vmem>>, vector<8x8xbf16>
    %7 = arith.truncf %0 : vector<8x128xf32> to vector<8x128xbf16>
    %cst = arith.constant dense<0.000000e+00> : vector<24x128xf32>
    %8 = tpu.matmul %3, %7, %cst {dimension_numbers = #tpu.dot_dimension_numbers<[1], [0], [0], [1], [0, 0, 1, 1], [], []>} : vector<24x8xbf16>, vector<8x128xbf16>, vector<24x128xf32> -> vector<24x128xf32>
    %9 = arith.truncf %8 : vector<24x128xf32> to vector<24x128xbf16>
    %cst_11 = arith.constant dense<0.000000e+00> : vector<24x128xf32>
    %10 = tpu.matmul %4, %7, %cst_11 {dimension_numbers = #tpu.dot_dimension_numbers<[1], [0], [0], [1], [0, 0, 1, 1], [], []>} : vector<24x8xbf16>, vector<8x128xbf16>, vector<24x128xf32> -> vector<24x128xf32>
    %11 = arith.truncf %10 : vector<24x128xf32> to vector<24x128xbf16>
    %12 = tpu.concatenate %9, %11, %2 in 1 : vector<24x128xbf16>, vector<24x128xbf16>, vector<24x128xbf16> -> vector<24x384xbf16>
    %c0_12 = arith.constant 0 : index
    %c0_13 = arith.constant 0 : index
    %c0_14 = arith.constant 0 : index
    %13 = vector.load %arg6[%c0_12, %c0_13, %c0_14] : memref<2x384x128xbf16, #tpu.memory_space<vmem>>, vector<1x384x128xbf16>
    %14 = vector.shape_cast %13 : vector<1x384x128xbf16> to vector<384x128xbf16>
    %cst_15 = arith.constant dense<0.000000e+00> : vector<24x128xf32>
    %15 = tpu.matmul %12, %14, %cst_15 {dimension_numbers = #tpu.dot_dimension_numbers<[1], [0], [0], [1], [0, 0, 1, 1], [], []>} : vector<24x384xbf16>, vector<384x128xbf16>, vector<24x128xf32> -> vector<24x128xf32>
    %c0_16 = arith.constant 0 : index
    %c0_17 = arith.constant 0 : index
    %c0_18 = arith.constant 0 : index
    %16 = vector.load %arg7[%c0_16, %c0_17, %c0_18] : memref<2x1x128xf32, #tpu.memory_space<vmem>>, vector<1x1x128xf32>
    %17 = vector.shape_cast %16 : vector<1x1x128xf32> to vector<1x128xf32>
    %18 = vector.broadcast %17 : vector<1x128xf32> to vector<24x128xf32>
    %19 = arith.addf %15, %18 : vector<24x128xf32>
    %cst_19 = arith.constant 0.000000e+00 : f32
    %20 = vector.broadcast %cst_19 : f32 to vector<24x128xf32>
    %21 = arith.maximumf %19, %20 : vector<24x128xf32>
    %22 = arith.truncf %21 : vector<24x128xf32> to vector<24x128xbf16>
    %c0_20 = arith.constant 0 : index
    %c0_21 = arith.constant 0 : index
    %c0_22 = arith.constant 0 : index
    %23 = vector.load %arg8[%c0_20, %c0_21, %c0_22] : memref<2x128x128xbf16, #tpu.memory_space<vmem>>, vector<1x128x128xbf16>
    %24 = vector.shape_cast %23 : vector<1x128x128xbf16> to vector<128x128xbf16>
    %cst_23 = arith.constant dense<0.000000e+00> : vector<24x128xf32>
    %25 = tpu.matmul %22, %24, %cst_23 {dimension_numbers = #tpu.dot_dimension_numbers<[1], [0], [0], [1], [0, 0, 1, 1], [], []>} : vector<24x128xbf16>, vector<128x128xbf16>, vector<24x128xf32> -> vector<24x128xf32>
    %c0_24 = arith.constant 0 : index
    %c0_25 = arith.constant 0 : index
    %c0_26 = arith.constant 0 : index
    %26 = vector.load %arg9[%c0_24, %c0_25, %c0_26] : memref<2x1x128xf32, #tpu.memory_space<vmem>>, vector<1x1x128xf32>
    %27 = vector.shape_cast %26 : vector<1x1x128xf32> to vector<1x128xf32>
    %28 = vector.broadcast %27 : vector<1x128xf32> to vector<24x128xf32>
    %29 = arith.addf %25, %28 : vector<24x128xf32>
    %30 = arith.truncf %29 : vector<24x128xf32> to vector<24x128xbf16>
    %cst_27 = arith.constant dense<0.000000e+00> : vector<8x128xf32>
    %31 = tpu.matmul %5, %30, %cst_27 {dimension_numbers = #tpu.dot_dimension_numbers<[1], [0], [0], [1], [0, 0, 1, 1], [], []>} : vector<8x24xbf16>, vector<24x128xbf16>, vector<8x128xf32> -> vector<8x128xf32>
    %32 = arith.truncf %31 : vector<8x128xf32> to vector<8x128xbf16>
    %cst_28 = arith.constant dense<0.000000e+00> : vector<8x128xf32>
    %33 = tpu.matmul %6, %32, %cst_28 {dimension_numbers = #tpu.dot_dimension_numbers<[1], [0], [0], [1], [0, 0, 1, 1], [], []>} : vector<8x8xbf16>, vector<8x128xbf16>, vector<8x128xf32> -> vector<8x128xf32>
    %34 = arith.truncf %33 : vector<8x128xf32> to vector<8x128xbf16>
    %cst_29 = arith.constant dense<0.000000e+00> : vector<8x128xf32>
    %35 = tpu.matmul %6, %34, %cst_29 {dimension_numbers = #tpu.dot_dimension_numbers<[1], [0], [0], [1], [0, 0, 1, 1], [], []>} : vector<8x8xbf16>, vector<8x128xbf16>, vector<8x128xf32> -> vector<8x128xf32>
    %36 = tpu.concatenate %31, %33, %35 in 1 : vector<8x128xf32>, vector<8x128xf32>, vector<8x128xf32> -> vector<8x384xf32>
    %37 = arith.truncf %36 : vector<8x384xf32> to vector<8x384xbf16>
    %c0_30 = arith.constant 0 : index
    %c0_31 = arith.constant 0 : index
    %c0_32 = arith.constant 0 : index
    %c0_33 = arith.constant 0 : index
    %38 = vector.load %arg10[%c0_30, %c0_31, %c0_32, %c0_33] : memref<2x2x384x128xbf16, #tpu.memory_space<vmem>>, vector<1x1x384x128xbf16>
    %39 = vector.shape_cast %38 : vector<1x1x384x128xbf16> to vector<384x128xbf16>
    %cst_34 = arith.constant dense<0.000000e+00> : vector<8x128xf32>
    %40 = tpu.matmul %37, %39, %cst_34 {dimension_numbers = #tpu.dot_dimension_numbers<[1], [0], [0], [1], [0, 0, 1, 1], [], []>} : vector<8x384xbf16>, vector<384x128xbf16>, vector<8x128xf32> -> vector<8x128xf32>
    %c0_35 = arith.constant 0 : index
    %c0_36 = arith.constant 0 : index
    %c0_37 = arith.constant 0 : index
    %c0_38 = arith.constant 0 : index
    %41 = vector.load %arg11[%c0_35, %c0_36, %c0_37, %c0_38] : memref<2x2x1x128xf32, #tpu.memory_space<vmem>>, vector<1x1x1x128xf32>
    %42 = vector.shape_cast %41 : vector<1x1x1x128xf32> to vector<1x128xf32>
    %43 = vector.broadcast %42 : vector<1x128xf32> to vector<8x128xf32>
    %44 = arith.addf %40, %43 : vector<8x128xf32>
    %cst_39 = arith.constant 0.000000e+00 : f32
    %45 = vector.broadcast %cst_39 : f32 to vector<8x128xf32>
    %46 = arith.maximumf %44, %45 : vector<8x128xf32>
    %47 = arith.truncf %46 : vector<8x128xf32> to vector<8x128xbf16>
    %cst_40 = arith.constant dense<0.000000e+00> : vector<8x128xf32>
    %48 = tpu.matmul %6, %47, %cst_40 {dimension_numbers = #tpu.dot_dimension_numbers<[1], [0], [0], [1], [0, 0, 1, 1], [], []>} : vector<8x8xbf16>, vector<8x128xbf16>, vector<8x128xf32> -> vector<8x128xf32>
    %49 = arith.truncf %48 : vector<8x128xf32> to vector<8x128xbf16>
    %cst_41 = arith.constant dense<0.000000e+00> : vector<8x128xf32>
    %50 = tpu.matmul %6, %49, %cst_41 {dimension_numbers = #tpu.dot_dimension_numbers<[1], [0], [0], [1], [0, 0, 1, 1], [], []>} : vector<8x8xbf16>, vector<8x128xbf16>, vector<8x128xf32> -> vector<8x128xf32>
    %51 = tpu.concatenate %46, %48, %50 in 1 : vector<8x128xf32>, vector<8x128xf32>, vector<8x128xf32> -> vector<8x384xf32>
    %52 = arith.truncf %51 : vector<8x384xf32> to vector<8x384xbf16>
    %c0_42 = arith.constant 0 : index
    %c1 = arith.constant 1 : index
    %c0_43 = arith.constant 0 : index
    %c0_44 = arith.constant 0 : index
    %53 = vector.load %arg10[%c0_42, %c1, %c0_43, %c0_44] : memref<2x2x384x128xbf16, #tpu.memory_space<vmem>>, vector<1x1x384x128xbf16>
    %54 = vector.shape_cast %53 : vector<1x1x384x128xbf16> to vector<384x128xbf16>
    %cst_45 = arith.constant dense<0.000000e+00> : vector<8x128xf32>
    %55 = tpu.matmul %52, %54, %cst_45 {dimension_numbers = #tpu.dot_dimension_numbers<[1], [0], [0], [1], [0, 0, 1, 1], [], []>} : vector<8x384xbf16>, vector<384x128xbf16>, vector<8x128xf32> -> vector<8x128xf32>
    %c0_46 = arith.constant 0 : index
    %c1_47 = arith.constant 1 : index
    %c0_48 = arith.constant 0 : index
    %c0_49 = arith.constant 0 : index
    %56 = vector.load %arg11[%c0_46, %c1_47, %c0_48, %c0_49] : memref<2x2x1x128xf32, #tpu.memory_space<vmem>>, vector<1x1x1x128xf32>
    %57 = vector.shape_cast %56 : vector<1x1x1x128xf32> to vector<1x128xf32>
    %58 = vector.broadcast %57 : vector<1x128xf32> to vector<8x128xf32>
    %59 = arith.addf %55, %58 : vector<8x128xf32>
    %60 = arith.addf %0, %59 : vector<8x128xf32>
    %61 = arith.truncf %60 : vector<8x128xf32> to vector<8x128xbf16>
    %cst_50 = arith.constant dense<0.000000e+00> : vector<24x128xf32>
    %62 = tpu.matmul %3, %61, %cst_50 {dimension_numbers = #tpu.dot_dimension_numbers<[1], [0], [0], [1], [0, 0, 1, 1], [], []>} : vector<24x8xbf16>, vector<8x128xbf16>, vector<24x128xf32> -> vector<24x128xf32>
    %63 = arith.truncf %62 : vector<24x128xf32> to vector<24x128xbf16>
    %cst_51 = arith.constant dense<0.000000e+00> : vector<24x128xf32>
    %64 = tpu.matmul %4, %61, %cst_51 {dimension_numbers = #tpu.dot_dimension_numbers<[1], [0], [0], [1], [0, 0, 1, 1], [], []>} : vector<24x8xbf16>, vector<8x128xbf16>, vector<24x128xf32> -> vector<24x128xf32>
    %65 = arith.truncf %64 : vector<24x128xf32> to vector<24x128xbf16>
    %66 = tpu.concatenate %63, %65, %2 in 1 : vector<24x128xbf16>, vector<24x128xbf16>, vector<24x128xbf16> -> vector<24x384xbf16>
    %c1_52 = arith.constant 1 : index
    %c0_53 = arith.constant 0 : index
    %c0_54 = arith.constant 0 : index
    %67 = vector.load %arg6[%c1_52, %c0_53, %c0_54] : memref<2x384x128xbf16, #tpu.memory_space<vmem>>, vector<1x384x128xbf16>
    %68 = vector.shape_cast %67 : vector<1x384x128xbf16> to vector<384x128xbf16>
    %cst_55 = arith.constant dense<0.000000e+00> : vector<24x128xf32>
    %69 = tpu.matmul %66, %68, %cst_55 {dimension_numbers = #tpu.dot_dimension_numbers<[1], [0], [0], [1], [0, 0, 1, 1], [], []>} : vector<24x384xbf16>, vector<384x128xbf16>, vector<24x128xf32> -> vector<24x128xf32>
    %c1_56 = arith.constant 1 : index
    %c0_57 = arith.constant 0 : index
    %c0_58 = arith.constant 0 : index
    %70 = vector.load %arg7[%c1_56, %c0_57, %c0_58] : memref<2x1x128xf32, #tpu.memory_space<vmem>>, vector<1x1x128xf32>
    %71 = vector.shape_cast %70 : vector<1x1x128xf32> to vector<1x128xf32>
    %72 = vector.broadcast %71 : vector<1x128xf32> to vector<24x128xf32>
    %73 = arith.addf %69, %72 : vector<24x128xf32>
    %cst_59 = arith.constant 0.000000e+00 : f32
    %74 = vector.broadcast %cst_59 : f32 to vector<24x128xf32>
    %75 = arith.maximumf %73, %74 : vector<24x128xf32>
    %76 = arith.truncf %75 : vector<24x128xf32> to vector<24x128xbf16>
    %c1_60 = arith.constant 1 : index
    %c0_61 = arith.constant 0 : index
    %c0_62 = arith.constant 0 : index
    %77 = vector.load %arg8[%c1_60, %c0_61, %c0_62] : memref<2x128x128xbf16, #tpu.memory_space<vmem>>, vector<1x128x128xbf16>
    %78 = vector.shape_cast %77 : vector<1x128x128xbf16> to vector<128x128xbf16>
    %cst_63 = arith.constant dense<0.000000e+00> : vector<24x128xf32>
    %79 = tpu.matmul %76, %78, %cst_63 {dimension_numbers = #tpu.dot_dimension_numbers<[1], [0], [0], [1], [0, 0, 1, 1], [], []>} : vector<24x128xbf16>, vector<128x128xbf16>, vector<24x128xf32> -> vector<24x128xf32>
    %c1_64 = arith.constant 1 : index
    %c0_65 = arith.constant 0 : index
    %c0_66 = arith.constant 0 : index
    %80 = vector.load %arg9[%c1_64, %c0_65, %c0_66] : memref<2x1x128xf32, #tpu.memory_space<vmem>>, vector<1x1x128xf32>
    %81 = vector.shape_cast %80 : vector<1x1x128xf32> to vector<1x128xf32>
    %82 = vector.broadcast %81 : vector<1x128xf32> to vector<24x128xf32>
    %83 = arith.addf %79, %82 : vector<24x128xf32>
    %84 = arith.truncf %83 : vector<24x128xf32> to vector<24x128xbf16>
    %cst_67 = arith.constant dense<0.000000e+00> : vector<8x128xf32>
    %85 = tpu.matmul %5, %84, %cst_67 {dimension_numbers = #tpu.dot_dimension_numbers<[1], [0], [0], [1], [0, 0, 1, 1], [], []>} : vector<8x24xbf16>, vector<24x128xbf16>, vector<8x128xf32> -> vector<8x128xf32>
    %86 = arith.truncf %85 : vector<8x128xf32> to vector<8x128xbf16>
    %cst_68 = arith.constant dense<0.000000e+00> : vector<8x128xf32>
    %87 = tpu.matmul %6, %86, %cst_68 {dimension_numbers = #tpu.dot_dimension_numbers<[1], [0], [0], [1], [0, 0, 1, 1], [], []>} : vector<8x8xbf16>, vector<8x128xbf16>, vector<8x128xf32> -> vector<8x128xf32>
    %88 = arith.truncf %87 : vector<8x128xf32> to vector<8x128xbf16>
    %cst_69 = arith.constant dense<0.000000e+00> : vector<8x128xf32>
    %89 = tpu.matmul %6, %88, %cst_69 {dimension_numbers = #tpu.dot_dimension_numbers<[1], [0], [0], [1], [0, 0, 1, 1], [], []>} : vector<8x8xbf16>, vector<8x128xbf16>, vector<8x128xf32> -> vector<8x128xf32>
    %90 = tpu.concatenate %85, %87, %89 in 1 : vector<8x128xf32>, vector<8x128xf32>, vector<8x128xf32> -> vector<8x384xf32>
    %91 = arith.truncf %90 : vector<8x384xf32> to vector<8x384xbf16>
    %c1_70 = arith.constant 1 : index
    %c0_71 = arith.constant 0 : index
    %c0_72 = arith.constant 0 : index
    %c0_73 = arith.constant 0 : index
    %92 = vector.load %arg10[%c1_70, %c0_71, %c0_72, %c0_73] : memref<2x2x384x128xbf16, #tpu.memory_space<vmem>>, vector<1x1x384x128xbf16>
    %93 = vector.shape_cast %92 : vector<1x1x384x128xbf16> to vector<384x128xbf16>
    %cst_74 = arith.constant dense<0.000000e+00> : vector<8x128xf32>
    %94 = tpu.matmul %91, %93, %cst_74 {dimension_numbers = #tpu.dot_dimension_numbers<[1], [0], [0], [1], [0, 0, 1, 1], [], []>} : vector<8x384xbf16>, vector<384x128xbf16>, vector<8x128xf32> -> vector<8x128xf32>
    %c1_75 = arith.constant 1 : index
    %c0_76 = arith.constant 0 : index
    %c0_77 = arith.constant 0 : index
    %c0_78 = arith.constant 0 : index
    %95 = vector.load %arg11[%c1_75, %c0_76, %c0_77, %c0_78] : memref<2x2x1x128xf32, #tpu.memory_space<vmem>>, vector<1x1x1x128xf32>
    %96 = vector.shape_cast %95 : vector<1x1x1x128xf32> to vector<1x128xf32>
    %97 = vector.broadcast %96 : vector<1x128xf32> to vector<8x128xf32>
    %98 = arith.addf %94, %97 : vector<8x128xf32>
    %cst_79 = arith.constant 0.000000e+00 : f32
    %99 = vector.broadcast %cst_79 : f32 to vector<8x128xf32>
    %100 = arith.maximumf %98, %99 : vector<8x128xf32>
    %101 = arith.truncf %100 : vector<8x128xf32> to vector<8x128xbf16>
    %cst_80 = arith.constant dense<0.000000e+00> : vector<8x128xf32>
    %102 = tpu.matmul %6, %101, %cst_80 {dimension_numbers = #tpu.dot_dimension_numbers<[1], [0], [0], [1], [0, 0, 1, 1], [], []>} : vector<8x8xbf16>, vector<8x128xbf16>, vector<8x128xf32> -> vector<8x128xf32>
    %103 = arith.truncf %102 : vector<8x128xf32> to vector<8x128xbf16>
    %cst_81 = arith.constant dense<0.000000e+00> : vector<8x128xf32>
    %104 = tpu.matmul %6, %103, %cst_81 {dimension_numbers = #tpu.dot_dimension_numbers<[1], [0], [0], [1], [0, 0, 1, 1], [], []>} : vector<8x8xbf16>, vector<8x128xbf16>, vector<8x128xf32> -> vector<8x128xf32>
    %105 = tpu.concatenate %100, %102, %104 in 1 : vector<8x128xf32>, vector<8x128xf32>, vector<8x128xf32> -> vector<8x384xf32>
    %106 = arith.truncf %105 : vector<8x384xf32> to vector<8x384xbf16>
    %c1_82 = arith.constant 1 : index
    %c1_83 = arith.constant 1 : index
    %c0_84 = arith.constant 0 : index
    %c0_85 = arith.constant 0 : index
    %107 = vector.load %arg10[%c1_82, %c1_83, %c0_84, %c0_85] : memref<2x2x384x128xbf16, #tpu.memory_space<vmem>>, vector<1x1x384x128xbf16>
    %108 = vector.shape_cast %107 : vector<1x1x384x128xbf16> to vector<384x128xbf16>
    %cst_86 = arith.constant dense<0.000000e+00> : vector<8x128xf32>
    %109 = tpu.matmul %106, %108, %cst_86 {dimension_numbers = #tpu.dot_dimension_numbers<[1], [0], [0], [1], [0, 0, 1, 1], [], []>} : vector<8x384xbf16>, vector<384x128xbf16>, vector<8x128xf32> -> vector<8x128xf32>
    %c1_87 = arith.constant 1 : index
    %c1_88 = arith.constant 1 : index
    %c0_89 = arith.constant 0 : index
    %c0_90 = arith.constant 0 : index
    %110 = vector.load %arg11[%c1_87, %c1_88, %c0_89, %c0_90] : memref<2x2x1x128xf32, #tpu.memory_space<vmem>>, vector<1x1x1x128xf32>
    %111 = vector.shape_cast %110 : vector<1x1x1x128xf32> to vector<1x128xf32>
    %112 = vector.broadcast %111 : vector<1x128xf32> to vector<8x128xf32>
    %113 = arith.addf %109, %112 : vector<8x128xf32>
    %c0_91 = arith.constant 0 : index
    %c0_92 = arith.constant 0 : index
    %114 = vector.load %arg12[%c0_91, %c0_92] : memref<8x128xf32, #tpu.memory_space<vmem>>, vector<8x128xf32>
    tpu.vector_store %arg12[%c0_91, %c0_92], %113 {strides = array<i32>} : memref<8x128xf32, #tpu.memory_space<vmem>>, vector<8x128xf32>,
    return
  }
}

</mosaic_0001>

<bundles_post_ra>
// kernel: skip_pfn_forward.1
= control target key start
LH: loop header
LB: loop body
LE: loop exit
PB: predicated region body
PF: predicated region fallthrough
CT: control target
= control target key end

     0   :  { %17 = vsyncpa [#allocation3], 0  ;;  %s4087_s0 = inlined_call_operand.vmem [shape: f32[8,128], index: 0, kind: input, shape index: {}]   ;;  %s4088_s1 = inlined_call_operand.vmem [shape: f32[24,128], index: 1, kind: input, shape index: {}]   ;;  %s4089_s2 = inlined_call_operand.vmem [shape: bf16[24,8], index: 2, kind: input, shape index: {}]   ;;  %s4090_s3 = inlined_call_operand.vmem [shape: bf16[24,8], index: 3, kind: input, shape index: {}]   ;;  %s4091_s4 = inlined_call_operand.vmem [shape: bf16[8,24], index: 4, kind: input, shape index: {}]   ;;  %s4092_s5 = inlined_call_operand.vmem [shape: bf16[8,8], index: 5, kind: input, shape index: {}]   ;;  %s4093_s6 = inlined_call_operand.hbm [shape: bf16[2,384,128], index: 6, kind: input, shape index: {}]   ;;  %s4094_s7 = inlined_call_operand.vmem [shape: f32[2,1,128], index: 7, kind: input, shape index: {}]   ;;  %s4095_s8 = inlined_call_operand.hbm [shape: bf16[2,128,128], index: 8, kind: input, shape index: {}]   ;;  %s4096_s9 = inlined_call_operand.vmem [shape: f32[2,1,128], index: 9, kind: input, shape index: {}]   ;;  %s4097_s10 = inlined_call_operand.hbm [shape: bf16[2,2,384,128], index: 10, kind: input, shape index: {}]   ;;  %s4098_s11 = inlined_call_operand.vmem [shape: f32[2,2,1,128], index: 11, kind: input, shape index: {}]   ;;  %s4099_s12 = inlined_call_operand.hbm [shape: f32[8,128], index: 12, kind: output, shape index: {}]  }
   0x1   :  { %18 = vsyncpa [#allocation6], 0 }
   0x2   :  { %19 = vsyncpa [#allocation4], 0  ;;  %s3745_s21 = smov [#allocation5]   ;;  %s3746_s23 = smov [#allocation2]  }
   0x3   :  { %s51_s22 = sshll.u32 %s3745_s21, 4  ;;  %s37_s24 = sshll.u32 %s3746_s23, 4  ;;  %s52_s22 = int_to_ptr.vmem [resolvable:$true] %s51_s22  ;;  %s3818_s24 = int_to_ptr.vmem [resolvable:$true] %s37_s24 }
   0x4   :  { %s3651_s27 = scalar_lea.hbm %s4095_s8, 2048 }
   0x5   :  { %p3652_p0 = scmp.ne.s32.totalorder %s4095_s8, %s3651_s27  ;;  %p3655_p1 = scmp.lt.u32.totalorder %s3651_s27, %s4095_s8 }
   0x7   :  { %p3657_p2 = pnand %p3655_p1, %p3652_p0 }
   0x9   :  { %3660 = shalt.err (!%p3657_p2)
}
   0xa   :  { %s3661_s14 = scalar_lea.vmem %s52_s22, 2048  ;;  %p3666_p4 = scmp.lt.s32.totalorder %s52_s22, %s52_s22 }
   0xb   :  { %p3662_p3 = scmp.ne.s32.totalorder %s52_s22, %s3661_s14  ;;  %p3667_p5 = scmp.lt.s32.totalorder %s3661_s14, %s3661_s14 }
   0xd   :  { %p3668_p6 = por %p3667_p5, %p3666_p4 }
   0xf   :  { %p3669_p7 = pnand %p3668_p6, %p3662_p3 }
  0x11   :  { %3672 = shalt.err (!%p3669_p7)
}
  0x12   :  { %s3747_s15 = smov 64   ;;  %s3748_s16 = smov 4  }
  0x13   :  { %57 = dma.hbm_to_vmem [thread:$0]  %s4095_s8, 2048, %s52_s22, [#allocation6], %s3747_s15, %s3747_s15, %s3748_s16  }
  0x14   :  { %s3673_s21 = scalar_lea.hbm %s4093_s6, 6144 }
  0x15   :  { %p3674_p8 = scmp.ne.s32.totalorder %s4093_s6, %s3673_s21  ;;  %p3677_p9 = scmp.lt.u32.totalorder %s3673_s21, %s4093_s6 }
  0x17   :  { %p3679_p10 = pnand %p3677_p9, %p3674_p8 }
  0x19   :  { %3682 = shalt.err (!%p3679_p10)
}
  0x1a   :  { %s3683_s28 = scalar_lea.vmem %s3818_s24, 6144  ;;  %p3688_p12 = scmp.lt.s32.totalorder %s3818_s24, %s3818_s24 }
  0x1b   :  { %p3684_p11 = scmp.ne.s32.totalorder %s3818_s24, %s3683_s28  ;;  %p3689_p13 = scmp.lt.s32.totalorder %s3683_s28, %s3683_s28 }
  0x1d   :  { %p3690_p0 = por %p3689_p13, %p3688_p12 }
  0x1f   :  { %p3691_p1 = pnand %p3690_p0, %p3684_p11 }
  0x21   :  { %3694 = shalt.err (!%p3691_p1)
}
  0x22   :  { %43 = dma.hbm_to_vmem [thread:$0]  %s4093_s6, 6144, %s3818_s24, [#allocation3], %s3747_s15, %s3747_s15, %s3748_s16  }
  0x23   :  { %s3749_s29 = smov [#allocation7]   ;;  %s3695_s17 = scalar_lea.hbm %s4097_s10, 12288 }
  0x24   :  { %s65_s30 = sshll.u32 %s3749_s29, 4  ;;  %p3696_p2 = scmp.ne.s32.totalorder %s4097_s10, %s3695_s17  ;;  %s66_s30 = int_to_ptr.vmem [resolvable:$true] %s65_s30 }
  0x25   :  { %p3699_p3 = scmp.lt.u32.totalorder %s3695_s17, %s4097_s10 }
  0x27   :  { %p3701_p4 = pnand %p3699_p3, %p3696_p2 }
  0x29   :  { %3704 = shalt.err (!%p3701_p4)
}
  0x2a   :  { %s3705_s23 = scalar_lea.vmem %s66_s30, 12288  ;;  %p3710_p6 = scmp.lt.s32.totalorder %s66_s30, %s66_s30 }
  0x2b   :  { %p3706_p5 = scmp.ne.s32.totalorder %s66_s30, %s3705_s23  ;;  %p3711_p7 = scmp.lt.s32.totalorder %s3705_s23, %s3705_s23 }
  0x2d   :  { %p3712_p8 = por %p3711_p7, %p3710_p6 }
  0x2f   :  { %p3713_p9 = pnand %p3712_p8, %p3706_p5 }
  0x31   :  { %3716 = shalt.err (!%p3713_p9)
}
  0x32   :  { %71 = dma.hbm_to_vmem [thread:$0]  %s4097_s10, 12288, %s66_s30, [#allocation6], %s3747_s15, %s3747_s15, %s3748_s16  }
  0x33   :  { %3739 = dma.done.wait [#allocation3], 6144  }
  0x34   :  { %3740 = vsyncadd [#allocation3], 4294961152 }
  0x35   :  { %3741 = dma.done.wait [#allocation6], 14336  }
  0x36   :  { %3742 = vsyncadd [#allocation6], 4294952960  ;;  %v84_v0 = vld [vmem:[%s4087_s0] sm:$0xff]  ;;  %vm114_vm0 = vcmask 1043456   ;;  %vm107_vm1 = vcmask 64512   ;;  %v3488_v9 = vld [vmem:[#allocation2 + $0x48] sm:$0xff]  }
  0x37   :  { %v98_v1 = vpack.c.bf16 %v84_v0, %v84_v0  ;;  %v3482_v2 = vld [vmem:[%s4089_s2] sm:$0xff]   ;;  %v3484_v4 = vld [vmem:[%s4089_s2 + $0x8] ss:$0 sps:$4 sm:$0xff]   ;;  %v3491_v12 = vld [vmem:[#allocation2 + $0x50] sm:$0xff]   ;;  %vm3751_vm2 = vmmov 0   ;;  %vm653_vm3 = vcmask 195584  }
  0x38   :  { %v3483_v3 = vld [vmem:[%s4090_s3] sm:$0xff]   ;;  %v3485_v6 = vld [vmem:[%s4090_s3 + $0x8] ss:$0 sps:$4 sm:$0xff]   ;;  %3224 = vmatprep.mubr.msk.bf16.mxu0 %vm107_vm1, %v3482_v2  ;;  %v3493_v14 = vld [vmem:[#allocation2 + $0x10] sm:$0xff]   ;;  %s3752_s20 = smov [#allocation8]  }
  0x39   :  { %3470 = vmatprep.subr.msk.bf16.mxu0 %vm114_vm0, %v98_v1  ;;  %3471 = vmatprep.subr.msk.bf16.mxu1 %vm114_vm0, %v98_v1  ;;  %v116_v5 = vsel %vm114_vm0, %v98_v1, 0  ;;  %v3486_v7 = vld [vmem:[#allocation2 + $0x40] sm:$0xff]   ;;  %v3490_v11 = vld [vmem:[#allocation2 + $0x8] sm:$0xff]   ;;  %v3494_v15 = vld [vmem:[#allocation2 + $0x58] sm:$0xff]   ;;  %s2763_s21 = sshll.u32 %s3752_s20, 4  ;;  %s2764_s21 = int_to_ptr.vmem [resolvable:$true] %s2763_s21 }
  0x3a   :  { %3223 = vmatpush3.bf16.msra.mxu0 %v116_v5  ;;  %3229 = vmatpush3.bf16.msra.mxu1 %v116_v5  ;;  %v3487_v8 = vld [vmem:[#allocation2] sm:$0xff]   ;;  %v3492_v13 = vld [vmem:[#allocation2 + $0x88] sm:$0xff]   ;;  %v3495_v16 = vld [vmem:[#allocation2 + $0x90] sm:$0xff]   ;;  %s3717_s23 = scalar_lea.vmem %s2764_s21, 128  ;;  %p3722_p11 = scmp.lt.s32.totalorder %s2764_s21, %s2764_s21 }
  0x3b   :  { %3230 = vmatprep.mubr.msk.bf16.mxu1 %vm107_vm1, %v3483_v3  ;;  %2974 = vmatprep.subr.bf16.mxu0 %v3486_v7  ;;  %v3489_v10 = vld [vmem:[#allocation2 + $0x80] sm:$0xff]   ;;  %v3496_v17 = vld [vmem:[#allocation2 + $0x18] sm:$0xff]   ;;  %v3500_v22 = vld [vmem:[#allocation2 + $0x68] sm:$0xff]   ;;  %p3718_p10 = scmp.ne.s32.totalorder %s2764_s21, %s3717_s23  ;;  %p3723_p12 = scmp.lt.s32.totalorder %s3717_s23, %s3717_s23 }
  0x3c   :  { %3234 = vmatprep.subr.bf16.mxu1 %v3489_v10  ;;  %v3498_v18 = vld [vmem:[#allocation2 + $0x98] sm:$0xff]   ;;  %v3497_v19 = vld [vmem:[#allocation2 + $0x60] sm:$0xff]   ;;  %v3502_v23 = vld [vmem:[#allocation2 + $0x28] sm:$0xff]  }
  0x3d   :  { %3225 = vmatmul.mubr.msk.bf16.vlgmr.msra.gmra.mrb[0].mxu0 %vm107_vm1, %v3484_v4  ;;  %3231 = vmatmul.mubr.msk.bf16.vlgmr.msra.gmra.mrb[0].mxu1 %vm107_vm1, %v3485_v6  ;;  %v3501_v20 = vld [vmem:[#allocation2 + $0xa0] sm:$0xff]   ;;  %v3504_v24 = vld [vmem:[#allocation2 + $0xa8] sm:$0xff]   ;;  %v3503_v25 = vld [vmem:[#allocation2 + $0x70] sm:$0xff]   ;;  %p3724_p13 = por %p3723_p12, %p3722_p11 }
  0x3e   :  { %2975 = vmatpush3.bf16.msra.mxu0 %v3487_v8  ;;  %3235 = vmatpush3.bf16.msra.mxu1 %v3489_v10  ;;  %v3499_v21 = vld [vmem:[#allocation2 + $0x20] sm:$0xff]   ;;  %v3505_v26 = vld [vmem:[#allocation2 + $0x30] sm:$0xff]   ;;  %v3506_v27 = vld [vmem:[#allocation2 + $0x78] sm:$0xff]  }
  0x3f   :  { %2976 = vmatprep.subr.bf16.mxu0 %v3488_v9  ;;  %3236 = vmatprep.subr.bf16.mxu1 %v3492_v13  ;;  %v3507_v28 = vld [vmem:[#allocation2 + $0xb0] sm:$0xff]   ;;  %v3508_v29 = vld [vmem:[#allocation2 + $0x38] sm:$0xff]   ;;  %v85_v31 = vld [vmem:[%s4088_s1] sm:$0xff]  ;;  %p3725_p0 = pnand %p3724_p13, %p3718_p10 }
  0x40   :  { %v3509_v30 = vld [vmem:[#allocation2 + $0xb8] sm:$0xff]   ;;  %v86_v32 = vld [vmem:[%s4088_s1 + $0x8] sm:$0xff]  ;;  %v87_v34 = vld [vmem:[%s4088_s1 + $0x10] sm:$0xff] }
  0x41   :  { %v3898_v33 = vpack.c.bf16 %v86_v32, %v85_v31  ;;  %v3903_v35 = vpack.c.bf16 %v87_v34, %v87_v34  ;;  %v3510_v36 = vld [vmem:[#allocation5] sm:$0xff]   ;;  %v3511_v47 = vld [vmem:[#allocation5 + $0x8] sm:$0xff]   ;;  %v3512_v49 = vld [vmem:[#allocation5 + $0x10] sm:$0xff]  }
  0x42   :  { %2977 = vmatpush3.bf16.msra.mxu0 %v3490_v11  ;;  %3237 = vmatpush3.bf16.msra.mxu1 %v3492_v13  ;;  %v3513_v51 = vld [vmem:[#allocation5 + $0x18] sm:$0xff]   ;;  %v3514_v52 = vld [vmem:[#allocation5 + $0x20] sm:$0xff]   ;;  %v3515_v56 = vld [vmem:[#allocation5 + $0x28] sm:$0xff]  }
  0x43   :  { %2978 = vmatprep.subr.bf16.mxu0 %v3491_v12  ;;  %3238 = vmatprep.subr.bf16.mxu1 %v3495_v16  ;;  %v3516_v58 = vld [vmem:[#allocation5 + $0x30] sm:$0xff]   ;;  %v3517_v59 = vld [vmem:[#allocation5 + $0x38] sm:$0xff]   ;;  %v2781_v62 = vld [vmem:[%s4094_s7] ss:$0 sm:$0xff] }
  0x44   :  { %3250 = vmatprep.mubr.bf16.mxu1 %v3898_v33  ;;  %v3924_v31 = vld [vmem:[%s4091_s4] sm:$0xf] }
  0x46   :  { %2979 = vmatpush3.bf16.msra.mxu0 %v3493_v14  ;;  %3239 = vmatpush3.bf16.msra.mxu1 %v3495_v16 }
  0x47   :  { %2980 = vmatprep.subr.bf16.mxu0 %v3494_v15  ;;  %3240 = vmatprep.subr.bf16.mxu1 %v3498_v18 }
  0x4a   :  { %2981 = vmatpush3.bf16.msra.mxu0 %v3496_v17  ;;  %3241 = vmatpush3.bf16.msra.mxu1 %v3498_v18 }
  0x4b   :  { %2982 = vmatprep.subr.bf16.mxu0 %v3497_v19  ;;  %3242 = vmatprep.subr.bf16.mxu1 %v3501_v20  ;;  %v3750_v19 = vmov 0.0  }
  0x4e   :  { %2983 = vmatpush3.bf16.msra.mxu0 %v3499_v21  ;;  %3243 = vmatpush3.bf16.msra.mxu1 %v3501_v20  ;;  %v2806_v21 = vld [vmem:[%s4096_s9] ss:$0 sm:$0xff] }
  0x4f   :  { %2984 = vmatprep.subr.bf16.mxu0 %v3500_v22  ;;  %3244 = vmatprep.subr.bf16.mxu1 %v3504_v24 }
  0x52   :  { %2985 = vmatpush3.bf16.msra.mxu0 %v3502_v23  ;;  %3245 = vmatpush3.bf16.msra.mxu1 %v3504_v24 }
  0x53   :  { %2986 = vmatprep.subr.bf16.mxu0 %v3503_v25  ;;  %3246 = vmatprep.subr.bf16.mxu1 %v3507_v28 }
  0x56   :  { %2987 = vmatpush3.bf16.msra.mxu0 %v3505_v26  ;;  %3247 = vmatpush3.bf16.msra.mxu1 %v3507_v28 }
  0x57   :  { %2988 = vmatprep.subr.bf16.mxu0 %v3506_v27  ;;  %3248 = vmatprep.subr.bf16.mxu1 %v3509_v30 }
  0x5a   :  { %2989 = vmatpush3.bf16.msra.mxu0 %v3508_v29  ;;  %3249 = vmatpush3.bf16.msra.mxu1 %v3509_v30 }
  0x5b   :  { %3254 = vmatprep.subr.bf16.mxu0 %v3510_v36  ;;  %3274 = vmatprep.subr.bf16.mxu1 %v3750_v19 }
  0x5d   :  { %3251 = vmatmul.mubr.bf16.vlgmr.msra.gmra.mrb[4].mxu1 %v3903_v35 }
  0x5e   :  { %3278 = vmatprep.mubr.msk.bf16.mxu1 %vm3751_vm2, %v3750_v19 }
 0x110   :  { %v3226_v37 = vpop.f32.mrb[0].mxu0  ;;  %v3232_v38 = vpop.f32.mrb[0].mxu1 }
 0x111   :  { %v152_v39 = vpop.f32.mrb[1].mxu0  ;;  %v216_v40 = vpop.f32.mrb[1].mxu1  ;;  %v231_v48 = vpack.c.bf16 %v3232_v38, %v3232_v38  ;;  %v167_v50 = vpack.c.bf16 %v3226_v37, %v3226_v37 }
 0x112   :  { %v3227_v41 = vpop.f32.mrb[2].mxu0  ;;  %v3233_v42 = vpop.f32.mrb[2].mxu1 }
 0x113   :  { %v155_v43 = vpop.f32.mrb[3].mxu0  ;;  %v219_v44 = vpop.f32.mrb[3].mxu1  ;;  %v3534_v41 = vld [vmem:[#allocation7 + $0x80] sm:$0xff]   ;;  %v3535_v42 = vld [vmem:[#allocation7 + $0x88] sm:$0xff]  }
 0x114   :  { %v166_v45 = vpack.c.bf16 %v155_v43, %v152_v39  ;;  %v230_v46 = vpack.c.bf16 %v219_v44, %v216_v40  ;;  %v3938_v40 = vld [vmem:[%s4092_s5] sm:$0xf]  ;;  %v3536_v43 = vld [vmem:[#allocation7 + $0x90] sm:$0xff]   ;;  %v3537_v44 = vld [vmem:[#allocation7 + $0x98] sm:$0xff]  }
 0x116   :  { %463 = vmatprep.mubr.bf16.mxu0 %v230_v46  ;;  %v3539_v46 = vld [vmem:[#allocation7 + $0xa8] sm:$0xff]  }
 0x117   :  { %464 = vmatmul.mubr.bf16.vlgmr.msra.gmra.mrb[4].mxu0 %v166_v45  ;;  %v3538_v45 = vld [vmem:[#allocation7 + $0xa0] sm:$0xff]  }
 0x118   :  { %471 = vmatprep.mubr.bf16.mxu0 %v231_v48  ;;  %3255 = vmatpush3.bf16.msra.mxu0 %v3510_v36 }
 0x119   :  { %3256 = vmatprep.subr.bf16.mxu0 %v3511_v47 }
 0x11c   :  { %3257 = vmatpush3.bf16.msra.mxu0 %v3511_v47  ;;  %v3540_v47 = vld [vmem:[#allocation7 + $0xb0] sm:$0xff]  }
 0x11d   :  { %3258 = vmatprep.subr.bf16.mxu0 %v3512_v49 }
 0x11f   :  { %472 = vmatmul.mubr.bf16.gmra.mrb[8].mxu0 %v167_v50 }
 0x120   :  { %3259 = vmatpush3.bf16.msra.mxu0 %v3512_v49 }
 0x121   :  { %3260 = vmatprep.subr.bf16.mxu0 %v3513_v51 }
 0x124   :  { %3261 = vmatpush3.bf16.msra.mxu0 %v3513_v51  ;;  %v3518_v51 = vld [vmem:[#allocation7 + $0x40] sm:$0xff]  }
 0x125   :  { %3262 = vmatprep.subr.bf16.mxu0 %v3514_v52 }
 0x128   :  { %3263 = vmatpush3.bf16.msra.mxu0 %v3514_v52 }
 0x129   :  { %3264 = vmatprep.subr.bf16.mxu0 %v3515_v56 }
 0x12c   :  { %3265 = vmatpush3.bf16.msra.mxu0 %v3515_v56  ;;  %v3520_v56 = vld [vmem:[#allocation7 + $0x48] sm:$0xff]  }
 0x12d   :  { %3266 = vmatprep.subr.bf16.mxu0 %v3516_v58 }
 0x130   :  { %v3252_v53 = vpop.f32.mrb[4].mxu1  ;;  %3267 = vmatpush3.bf16.msra.mxu0 %v3516_v58  ;;  %v3522_v58 = vld [vmem:[#allocation7 + $0x50] sm:$0xff]  }
 0x131   :  { %v513_v54 = vpop.f32.mrb[5].mxu1  ;;  %3268 = vmatprep.subr.bf16.mxu0 %v3517_v59 }
 0x132   :  { %v3253_v55 = vpop.f32.mrb[6].mxu1 }
 0x133   :  { %v516_v57 = vpop.f32.mrb[7].mxu1  ;;  %v3519_v55 = vld [vmem:[#allocation7] sm:$0xff]  }
 0x134   :  { %3269 = vmatpush3.bf16.msra.mxu0 %v3517_v59  ;;  %v3523_v59 = vld [vmem:[#allocation7 + $0x10] sm:$0xff]  }
 0x135   :  { %3294 = vmatprep.subr.bf16.mxu0 %v3750_v19 }
 0x1ea   :  { %v2990_v60 = vpop.f32.mrb[4].mxu0 }
 0x1eb   :  { %v2991_v61 = vpop.f32.mrb[5].mxu0 }
 0x1ec   :  { %v2992_v63 = vadd.f32 %v2991_v61, %v2990_v60  ;;  %v2993_v0 = vpop.f32.mrb[6].mxu0  ;;  %v3524_v60 = vld [vmem:[#allocation7 + $0x58] sm:$0xff]  }
 0x1ed   :  { %v2994_v1 = vpop.f32.mrb[7].mxu0  ;;  %v3525_v61 = vld [vmem:[#allocation7 + $0x18] sm:$0xff]  }
 0x1ee   :  { %v2995_v2 = vadd.f32 %v2994_v1, %v2993_v0  ;;  %v466_v3 = vadd.f32 %v2992_v63, %v2781_v62  ;;  %v3527_v63 = vld [vmem:[#allocation7 + $0x20] sm:$0xff]   ;;  %v3528_v0 = vld [vmem:[#allocation7 + $0x68] sm:$0xff]  }
 0x1ef   :  { %v3529_v1 = vld [vmem:[#allocation7 + $0x28] sm:$0xff]  }
 0x1f0   :  { %v514_v4 = vadd.f32 %v513_v54, %v466_v3  ;;  %v469_v5 = vadd.f32 %v2995_v2, %v2781_v62  ;;  %v3530_v2 = vld [vmem:[#allocation7 + $0x70] sm:$0xff]  }
 0x1f1   :  { %v3531_v3 = vld [vmem:[#allocation7 + $0x30] sm:$0xff]  }
 0x1f2   :  { %v517_v6 = vadd.f32 %v516_v57, %v469_v5  ;;  %v2996_v7 = vpop.f32.mrb[8].mxu0  ;;  %v527_v9 = vmax.f32 %v514_v4, 0.0  ;;  %v3521_v57 = vld [vmem:[#allocation7 + $0x8] sm:$0xff]   ;;  %v3532_v4 = vld [vmem:[#allocation7 + $0x78] sm:$0xff]  }
 0x1f3   :  { %v2997_v8 = vpop.f32.mrb[9].mxu0  ;;  %v3533_v5 = vld [vmem:[#allocation7 + $0x38] sm:$0xff]  }
 0x1f4   :  { %v528_v10 = vmax.f32 %v517_v6, 0.0  ;;  %v2998_v11 = vadd.f32 %v2997_v8, %v2996_v7  ;;  %v2999_v12 = vpop.f32.mrb[10].mxu0  ;;  %v3541_v6 = vld [vmem:[#allocation7 + $0xb8] sm:$0xff]  }
 0x1f5   :  { %v3000_v13 = vpop.f32.mrb[11].mxu0 }
 0x1f6   :  { %v530_v14 = vpack.c.bf16 %v528_v10, %v527_v9  ;;  %v474_v15 = vadd.f32 %v2998_v11, %v2781_v62  ;;  %v3526_v62 = vld [vmem:[#allocation7 + $0x60] sm:$0xff]  }
 0x1f8   :  { %v522_v16 = vadd.f32 %v3252_v53, %v474_v15  ;;  %3270 = vmatprep.mubr.bf16.mxu0 %v530_v14 }
 0x1fa   :  { %v529_v17 = vmax.f32 %v522_v16, 0.0 }
 0x1fc   :  { %v531_v18 = vpack.c.bf16 %v529_v17, %v529_v17  ;;  %v2818_v17 = vld [vmem:[%s4098_s11] ss:$0 sm:$0xff] }
 0x1fe   :  { %3271 = vmatmul.mubr.bf16.vlgmr.msra.gmra.mrb[12].mxu0 %v531_v18 }
 0x1ff   :  { %3310 = vmatprep.mubr.msk.bf16.mxu0 %vm3751_vm2, %v3750_v19  ;;  %3295 = vmatpush3.bf16.msra.mxu0 %v3534_v41  ;;  %v3551_v41 = vld [vmem:[#allocation7 + $0xe0] sm:$0xff]  }
 0x200   :  { %3296 = vmatprep.subr.bf16.mxu0 %v3750_v19 }
 0x203   :  { %3297 = vmatpush3.bf16.msra.mxu0 %v3535_v42  ;;  %v3552_v42 = vld [vmem:[#allocation7 + $0x128] sm:$0xff]  }
 0x204   :  { %3298 = vmatprep.subr.bf16.mxu0 %v3750_v19 }
 0x207   :  { %3299 = vmatpush3.bf16.msra.mxu0 %v3536_v43  ;;  %v3553_v43 = vld [vmem:[#allocation7 + $0xe8] sm:$0xff]  }
 0x208   :  { %3300 = vmatprep.subr.bf16.mxu0 %v3750_v19 }
 0x20b   :  { %3301 = vmatpush3.bf16.msra.mxu0 %v3537_v44  ;;  %v3554_v44 = vld [vmem:[#allocation7 + $0x130] sm:$0xff]  }
 0x20c   :  { %3302 = vmatprep.subr.bf16.mxu0 %v3750_v19 }
 0x20f   :  { %3303 = vmatpush3.bf16.msra.mxu0 %v3538_v45  ;;  %v3555_v45 = vld [vmem:[#allocation7 + $0xf0] sm:$0xff]  }
 0x210   :  { %3304 = vmatprep.subr.bf16.mxu0 %v3750_v19 }
 0x213   :  { %3305 = vmatpush3.bf16.msra.mxu0 %v3539_v46  ;;  %v3556_v46 = vld [vmem:[#allocation7 + $0x138] sm:$0xff]  }
 0x214   :  { %3306 = vmatprep.subr.bf16.mxu0 %v3750_v19 }
 0x217   :  { %3307 = vmatpush3.bf16.msra.mxu0 %v3540_v47  ;;  %v3557_v47 = vld [vmem:[#allocation7 + $0xf8] sm:$0xff]  }
 0x218   :  { %3308 = vmatprep.subr.bf16.mxu0 %v3750_v19 }
 0x21b   :  { %3309 = vmatpush3.bf16.msra.mxu0 %v3541_v6 }
 0x21c   :  { %3320 = vmatprep.subr.bf16.mxu0 %v3750_v19 }
 0x2d1   :  { %v3272_v20 = vpop.f32.mrb[12].mxu0 }
 0x2d2   :  { %v637_v22 = vpop.f32.mrb[13].mxu0  ;;  %v646_v24 = vadd.f32 %v3272_v20, %v2806_v21 }
 0x2d3   :  { %v3273_v23 = vpop.f32.mrb[14].mxu0  ;;  %v638_v26 = vadd.f32 %v2806_v21, %v637_v22 }
 0x2d4   :  { %v640_v25 = vpop.f32.mrb[15].mxu0  ;;  %v652_v29 = vpack.c.bf16 %v646_v24, %v646_v24 }
 0x2d5   :  { %v641_v27 = vadd.f32 %v2806_v21, %v640_v25 }
 0x2d6   :  { %v658_v30 = vsel %vm114_vm0, %v652_v29, 0  ;;  %v3543_v29 = vld [vmem:[#allocation7 + $0xc0] sm:$0xff]  }
 0x2d7   :  { %v651_v28 = vpack.c.bf16 %v641_v27, %v638_v26  ;;  %v3542_v27 = vld [vmem:[#allocation7 + $0x100] sm:$0xff]  }
 0x2d9   :  { %3275 = vmatpush3.bf16.msra.mxu1 %v651_v28 }
 0x2da   :  { %3276 = vmatprep.subr.bf16.mxu1 %v3750_v19 }
 0x2dd   :  { %3277 = vmatpush3.bf16.msra.mxu1 %v658_v30  ;;  %v3544_v30 = vld [vmem:[#allocation7 + $0x108] sm:$0xff]  }
 0x2de   :  { %3282 = vmatprep.subr.bf16.mxu1 %v3750_v19 }
 0x2e0   :  { %3279 = vmatmul.mubr.msk.bf16.vlgmr.msra.gmra.mrb[8].mxu1 %vm653_vm3, %v3924_v31 }
 0x2e1   :  { %3284 = vmatprep.mubr.msk.bf16.mxu1 %vm3751_vm2, %v3750_v19 }
 0x3b3   :  { %v694_v32 = vpop.f32.mrb[8].mxu1 }
 0x3b4   :  { %v3931_v34 = vpack.c.bf16 %v694_v32, %v694_v32  ;;  %v3280_v36 = vpop.f32.mrb[9].mxu1  ;;  %v3545_v32 = vld [vmem:[#allocation7 + $0xc8] sm:$0xff]  }
 0x3b5   :  { %v697_v37 = vpop.f32.mrb[10].mxu1  ;;  %v3547_v36 = vld [vmem:[#allocation7 + $0xd0] sm:$0xff]  }
 0x3b6   :  { %v705_v38 = vsel %vm114_vm0, %v3931_v34, 0  ;;  %v3281_v39 = vpop.f32.mrb[11].mxu1  ;;  %v3548_v37 = vld [vmem:[#allocation7 + $0x118] sm:$0xff]  }
 0x3b7   :  { %3283 = vmatpush3.bf16.msra.mxu1 %v705_v38  ;;  %v3549_v38 = vld [vmem:[#allocation7 + $0xd8] sm:$0xff]   ;;  %v3550_v39 = vld [vmem:[#allocation7 + $0x120] sm:$0xff]  }
 0x3b8   :  { %3288 = vmatprep.subr.bf16.mxu1 %v3750_v19 }
 0x3ba   :  { %3285 = vmatmul.mubr.msk.bf16.vlgmr.msra.gmra.mrb[12].mxu1 %vm107_vm1, %v3938_v40 }
 0x3bb   :  { %3290 = vmatprep.mubr.msk.bf16.mxu1 %vm3751_vm2, %v3750_v19 }
 0x48d   :  { %v741_v48 = vpop.f32.mrb[12].mxu1 }
 0x48e   :  { %v747_v49 = vpack.c.bf16 %v741_v48, %v741_v48  ;;  %v3286_v50 = vpop.f32.mrb[13].mxu1 }
 0x48f   :  { %v744_v52 = vpop.f32.mrb[14].mxu1 }
 0x490   :  { %v749_v53 = vsel %vm114_vm0, %v747_v49, 0  ;;  %v3287_v54 = vpop.f32.mrb[15].mxu1 }
 0x491   :  { %3289 = vmatpush3.bf16.msra.mxu1 %v749_v53  ;;  %v3558_v54 = vld [vmem:[#allocation7 + $0x140] sm:$0xff]  }
 0x492   :  { %3029 = vmatprep.subr.bf16.mxu1 %v3518_v51 }
 0x494   :  { %3291 = vmatmul.mubr.msk.bf16.vlgmr.msra.gmra.mrb[16].mxu1 %vm107_vm1, %v3938_v40 }
 0x495   :  { %3030 = vmatpush3.bf16.msra.mxu1 %v3519_v55  ;;  %1023 = vmatprep.mubr.bf16.mxu1 %v747_v49  ;;  %v3646_v55 = vld [vmem:[%s4089_s2] sm:$0xff]  }
 0x496   :  { %3031 = vmatprep.subr.bf16.mxu1 %v3520_v56  ;;  %v3559_v56 = vld [vmem:[#allocation7 + $0x148] sm:$0xff]  }
 0x499   :  { %3032 = vmatpush3.bf16.msra.mxu1 %v3521_v57  ;;  %v3560_v57 = vld [vmem:[#allocation7 + $0x150] sm:$0xff]  }
 0x49a   :  { %3033 = vmatprep.subr.bf16.mxu1 %v3522_v58  ;;  %v3561_v58 = vld [vmem:[#allocation7 + $0x158] sm:$0xff]  }
 0x49d   :  { %3034 = vmatpush3.bf16.msra.mxu1 %v3523_v59  ;;  %v3562_v59 = vld [vmem:[#allocation7 + $0x160] sm:$0xff]  }
 0x49e   :  { %3035 = vmatprep.subr.bf16.mxu1 %v3524_v60  ;;  %v3563_v60 = vld [vmem:[#allocation7 + $0x168] sm:$0xff]  }
 0x4a1   :  { %3036 = vmatpush3.bf16.msra.mxu1 %v3525_v61  ;;  %v3564_v61 = vld [vmem:[#allocation7 + $0x170] sm:$0xff]  }
 0x4a2   :  { %3037 = vmatprep.subr.bf16.mxu1 %v3526_v62  ;;  %v3565_v62 = vld [vmem:[#allocation7 + $0x178] sm:$0xff]  }
 0x4a5   :  { %3038 = vmatpush3.bf16.msra.mxu1 %v3527_v63 }
 0x4a6   :  { %3039 = vmatprep.subr.bf16.mxu1 %v3528_v0 }
 0x4a9   :  { %3040 = vmatpush3.bf16.msra.mxu1 %v3529_v1 }
 0x4aa   :  { %3041 = vmatprep.subr.bf16.mxu1 %v3530_v2 }
 0x4ad   :  { %3042 = vmatpush3.bf16.msra.mxu1 %v3531_v3 }
 0x4ae   :  { %3043 = vmatprep.subr.bf16.mxu1 %v3532_v4 }
 0x4b1   :  { %3044 = vmatpush3.bf16.msra.mxu1 %v3533_v5 }
 0x4b2   :  { %3314 = vmatprep.subr.bf16.mxu1 %v3750_v19 }
 0x4b4   :  { %1024 = vmatmul.mubr.bf16.vlgmr.msra.gmra.mrb[20].mxu1 %v3931_v34  ;;  %v3546_v34 = vld [vmem:[#allocation7 + $0x110] sm:$0xff]  }
 0x4b5   :  { %3316 = vmatprep.mubr.msk.bf16.mxu1 %vm3751_vm2, %v3750_v19 }
 0x567   :  { %v785_v7 = vpop.f32.mrb[16].mxu1 }
 0x568   :  { %v791_v8 = vpack.c.bf16 %v785_v7, %v785_v7  ;;  %v3292_v9 = vpop.f32.mrb[17].mxu1 }
 0x569   :  { %v788_v10 = vpop.f32.mrb[18].mxu1  ;;  %v3647_v9 = vld [vmem:[%s4090_s3] sm:$0xff]  }
 0x56a   :  { %v3293_v11 = vpop.f32.mrb[19].mxu1  ;;  %3311 = vmatmul.mubr.bf16.vlgmr.msra.gmra.mrb[16].mxu0 %v791_v8  ;;  %v2846_v10 = vld [vmem:[%s4098_s11 + $0x1] ss:$0 sm:$0xff] }
 0x56b   :  { %3322 = vmatprep.mubr.msk.bf16.mxu0 %vm3751_vm2, %v3750_v19 }
 0x587   :  { %v3045_v12 = vpop.f32.mrb[20].mxu1 }
 0x588   :  { %v3046_v13 = vpop.f32.mrb[21].mxu1 }
 0x589   :  { %v3047_v14 = vadd.f32 %v3046_v13, %v3045_v12  ;;  %v3048_v15 = vpop.f32.mrb[22].mxu1 }
 0x58a   :  { %v3049_v16 = vpop.f32.mrb[23].mxu1 }
 0x58b   :  { %v1026_v18 = vadd.f32 %v3047_v14, %v2818_v17  ;;  %v3648_v16 = vld [vmem:[%s4087_s0] sm:$0xff] }
 0x63d   :  { %v1065_v20 = vpop.f32.mrb[16].mxu0 }
 0x63e   :  { %v1066_v21 = vadd.f32 %v1065_v20, %v1026_v18  ;;  %v3312_v22 = vpop.f32.mrb[17].mxu0 }
 0x63f   :  { %v1068_v23 = vpop.f32.mrb[18].mxu0  ;;  %v3569_v22 = vld [vmem:[#allocation2 + $0x140] sm:$0xff]  }
 0x640   :  { %v1071_v24 = vmax.f32 %v1066_v21, 0.0  ;;  %v3313_v25 = vpop.f32.mrb[19].mxu0  ;;  %v3566_v21 = vld [vmem:[#allocation2 + $0x100] sm:$0xff]  }
 0x641   :  { %v3568_v25 = vld [vmem:[#allocation2 + $0x108] sm:$0xff]  }
 0x642   :  { %v1072_v26 = vpack.c.bf16 %v1071_v24, %v1071_v24  ;;  %v3567_v24 = vld [vmem:[#allocation2 + $0xc0] sm:$0xff]  }
 0x644   :  { %v1074_v28 = vsel %vm114_vm0, %v1072_v26, 0 }
 0x645   :  { %3315 = vmatpush3.bf16.msra.mxu1 %v1074_v28  ;;  %v3650_v28 = vld [vmem:[%s4090_s3 + $0x8] ss:$0 sps:$4 sm:$0xff]  }
 0x646   :  { %3064 = vmatprep.subr.bf16.mxu1 %v3542_v27  ;;  %v3649_v27 = vld [vmem:[%s4089_s2 + $0x8] ss:$0 sps:$4 sm:$0xff]  }
 0x648   :  { %3317 = vmatmul.mubr.msk.bf16.vlgmr.msra.gmra.mrb[24].mxu1 %vm107_vm1, %v3938_v40 }
 0x649   :  { %3065 = vmatpush3.bf16.msra.mxu1 %v3543_v29  ;;  %v3570_v29 = vld [vmem:[#allocation2 + $0xc8] sm:$0xff]  }
 0x64a   :  { %3066 = vmatprep.subr.bf16.mxu1 %v3544_v30  ;;  %v3571_v30 = vld [vmem:[#allocation2 + $0x110] sm:$0xff]  }
 0x64d   :  { %3067 = vmatpush3.bf16.msra.mxu1 %v3545_v32  ;;  %v3575_v32 = vld [vmem:[#allocation2 + $0x150] sm:$0xff]  }
 0x64e   :  { %3068 = vmatprep.subr.bf16.mxu1 %v3546_v34  ;;  %v3573_v34 = vld [vmem:[#allocation2 + $0xd0] sm:$0xff]  }
 0x651   :  { %3069 = vmatpush3.bf16.msra.mxu1 %v3547_v36  ;;  %v3574_v36 = vld [vmem:[#allocation2 + $0x118] sm:$0xff]  }
 0x652   :  { %3070 = vmatprep.subr.bf16.mxu1 %v3548_v37  ;;  %v3578_v37 = vld [vmem:[#allocation2 + $0x158] sm:$0xff]  }
 0x655   :  { %3071 = vmatpush3.bf16.msra.mxu1 %v3549_v38  ;;  %v3576_v38 = vld [vmem:[#allocation2 + $0xd8] sm:$0xff]  }
 0x656   :  { %3072 = vmatprep.subr.bf16.mxu1 %v3550_v39  ;;  %v3577_v39 = vld [vmem:[#allocation2 + $0x120] sm:$0xff]  }
 0x659   :  { %3073 = vmatpush3.bf16.msra.mxu1 %v3551_v41  ;;  %v3581_v41 = vld [vmem:[#allocation2 + $0x160] sm:$0xff]  }
 0x65a   :  { %3074 = vmatprep.subr.bf16.mxu1 %v3552_v42  ;;  %v3579_v42 = vld [vmem:[#allocation2 + $0xe0] sm:$0xff]  }
 0x65d   :  { %3075 = vmatpush3.bf16.msra.mxu1 %v3553_v43  ;;  %v3580_v43 = vld [vmem:[#allocation2 + $0x128] sm:$0xff]  }
 0x65e   :  { %3076 = vmatprep.subr.bf16.mxu1 %v3554_v44  ;;  %v3582_v44 = vld [vmem:[#allocation2 + $0xe8] sm:$0xff]  }
 0x661   :  { %3077 = vmatpush3.bf16.msra.mxu1 %v3555_v45  ;;  %v3583_v45 = vld [vmem:[#allocation2 + $0x130] sm:$0xff]  }
 0x662   :  { %3078 = vmatprep.subr.bf16.mxu1 %v3556_v46  ;;  %v3585_v46 = vld [vmem:[#allocation2 + $0xf0] sm:$0xff]  }
 0x665   :  { %3079 = vmatpush3.bf16.msra.mxu1 %v3557_v47  ;;  %v3586_v47 = vld [vmem:[#allocation2 + $0x138] sm:$0xff]  }
 0x71b   :  { %v1110_v48 = vpop.f32.mrb[24].mxu1 }
 0x71c   :  { %v1116_v49 = vpack.c.bf16 %v1110_v48, %v1110_v48  ;;  %v3318_v50 = vpop.f32.mrb[25].mxu1  ;;  %v3587_v48 = vld [vmem:[#allocation2 + $0x170] sm:$0xff]  }
 0x71d   :  { %v1113_v51 = vpop.f32.mrb[26].mxu1  ;;  %v3589_v50 = vld [vmem:[#allocation2 + $0x178] sm:$0xff]  }
 0x71e   :  { %v1118_v52 = vsel %vm114_vm0, %v1116_v49, 0  ;;  %v3319_v53 = vpop.f32.mrb[27].mxu1  ;;  %1394 = vmatprep.mubr.bf16.mxu1 %v1116_v49  ;;  %v3588_v49 = vld [vmem:[#allocation2 + $0xf8] sm:$0xff]   ;;  %v3590_v51 = vld [vmem:[#allocation5 + $0x40] sm:$0xff]  }
 0x71f   :  { %3321 = vmatpush3.bf16.msra.mxu0 %v1118_v52  ;;  %1395 = vmatmul.mubr.bf16.vlgmr.msra.gmra.mrb[28].mxu1 %v1072_v26  ;;  %v3572_v26 = vld [vmem:[#allocation2 + $0x148] sm:$0xff]  }
 0x720   :  { %3326 = vmatprep.subr.bf16.mxu0 %v3750_v19  ;;  %3348 = vmatprep.mubr.msk.bf16.mxu1 %vm107_vm1, %v3646_v55 }
 0x722   :  { %3323 = vmatmul.mubr.msk.bf16.vlgmr.msra.gmra.mrb[20].mxu0 %vm107_vm1, %v3938_v40 }
 0x723   :  { %3327 = vmatpush3.bf16.msra.mxu0 %v3558_v54  ;;  %3342 = vmatprep.mubr.msk.bf16.mxu0 %vm3751_vm2, %v3750_v19 }
 0x724   :  { %3328 = vmatprep.subr.bf16.mxu0 %v3750_v19 }
 0x727   :  { %3329 = vmatpush3.bf16.msra.mxu0 %v3559_v56 }
 0x728   :  { %3330 = vmatprep.subr.bf16.mxu0 %v3750_v19 }
 0x72b   :  { %3331 = vmatpush3.bf16.msra.mxu0 %v3560_v57 }
 0x72c   :  { %3332 = vmatprep.subr.bf16.mxu0 %v3750_v19 }
 0x72f   :  { %3333 = vmatpush3.bf16.msra.mxu0 %v3561_v58 }
 0x730   :  { %3334 = vmatprep.subr.bf16.mxu0 %v3750_v19 }
 0x733   :  { %3335 = vmatpush3.bf16.msra.mxu0 %v3562_v59 }
 0x734   :  { %3336 = vmatprep.subr.bf16.mxu0 %v3750_v19 }
 0x737   :  { %3337 = vmatpush3.bf16.msra.mxu0 %v3563_v60 }
 0x738   :  { %3338 = vmatprep.subr.bf16.mxu0 %v3750_v19 }
 0x73b   :  { %3339 = vmatpush3.bf16.msra.mxu0 %v3564_v61 }
 0x73c   :  { %3340 = vmatprep.subr.bf16.mxu0 %v3750_v19 }
 0x73f   :  { %3341 = vmatpush3.bf16.msra.mxu0 %v3565_v62  ;;  %v3591_v62 = vld [vmem:[#allocation5 + $0x48] sm:$0xff]  }
 0x7f2   :  { %v3080_v63 = vpop.f32.mrb[28].mxu1 }
 0x7f3   :  { %v3081_v0 = vpop.f32.mrb[29].mxu1 }
 0x7f4   :  { %v3082_v1 = vadd.f32 %v3081_v0, %v3080_v63  ;;  %v3083_v2 = vpop.f32.mrb[30].mxu1 }
 0x7f5   :  { %v1154_v3 = vpop.f32.mrb[20].mxu0  ;;  %v3084_v4 = vpop.f32.mrb[31].mxu1  ;;  %v3594_v2 = vld [vmem:[#allocation5 + $0x60] sm:$0xff]  }
 0x7f6   :  { %v1160_v5 = vpack.c.bf16 %v1154_v3, %v1154_v3  ;;  %v3324_v6 = vpop.f32.mrb[21].mxu0  ;;  %v1397_v11 = vadd.f32 %v3082_v1, %v2846_v10  ;;  %v3593_v1 = vld [vmem:[#allocation5 + $0x58] sm:$0xff]  }
 0x7f7   :  { %v1157_v7 = vpop.f32.mrb[22].mxu0  ;;  %v3595_v6 = vld [vmem:[#allocation5 + $0x68] sm:$0xff]  }
 0x7f8   :  { %v3325_v8 = vpop.f32.mrb[23].mxu0  ;;  %3343 = vmatmul.mubr.bf16.vlgmr.msra.gmra.mrb[24].mxu0 %v1160_v5 }
 0x7f9   :  { %3354 = vmatprep.mubr.msk.bf16.mxu0 %vm107_vm1, %v3647_v9  ;;  %v3596_v8 = vld [vmem:[#allocation5 + $0x70] sm:$0xff]   ;;  %v3597_v9 = vld [vmem:[#allocation5 + $0x78] sm:$0xff]  }
 0x8cb   :  { %v1436_v12 = vpop.f32.mrb[24].mxu0 }
 0x8cc   :  { %v1437_v13 = vadd.f32 %v1436_v12, %v1397_v11  ;;  %v3344_v14 = vpop.f32.mrb[25].mxu0  ;;  %v2876_v12 = vld [vmem:[%s4094_s7 + $0x1] ss:$0 sm:$0xff] }
 0x8cd   :  { %v1439_v15 = vpop.f32.mrb[26].mxu0 }
 0x8ce   :  { %v1442_v17 = vadd.f32 %v3648_v16, %v1437_v13  ;;  %v3345_v18 = vpop.f32.mrb[27].mxu0 }
 0x8d0   :  { %v1443_v20 = vpack.c.bf16 %v1442_v17, %v1442_v17 }
 0x8d2   :  { %3472 = vmatprep.subr.msk.bf16.mxu1 %vm114_vm0, %v1443_v20  ;;  %3473 = vmatprep.subr.msk.bf16.mxu0 %vm114_vm0, %v1443_v20  ;;  %v1445_v23 = vsel %vm114_vm0, %v1443_v20, 0 }
 0x8d3   :  { %3347 = vmatpush3.bf16.msra.mxu1 %v1445_v23  ;;  %3353 = vmatpush3.bf16.msra.mxu0 %v1445_v23 }
 0x8d4   :  { %3101 = vmatprep.subr.bf16.mxu1 %v3566_v21  ;;  %3358 = vmatprep.subr.bf16.mxu0 %v3569_v22 }
 0x8d6   :  { %3349 = vmatmul.mubr.msk.bf16.vlgmr.msra.gmra.mrb[32].mxu1 %vm107_vm1, %v3649_v27  ;;  %3355 = vmatmul.mubr.msk.bf16.vlgmr.msra.gmra.mrb[28].mxu0 %vm107_vm1, %v3650_v28 }
 0x8d7   :  { %3102 = vmatpush3.bf16.msra.mxu1 %v3567_v24  ;;  %3359 = vmatpush3.bf16.msra.mxu0 %v3569_v22 }
 0x8d8   :  { %3103 = vmatprep.subr.bf16.mxu1 %v3568_v25  ;;  %3360 = vmatprep.subr.bf16.mxu0 %v3572_v26 }
 0x8d9   :  { %3374 = vmatprep.mubr.bf16.mxu0 %v3898_v33  ;;  %v3584_v33 = vld [vmem:[#allocation2 + $0x168] sm:$0xff]  }
 0x8db   :  { %3104 = vmatpush3.bf16.msra.mxu1 %v3570_v29  ;;  %3361 = vmatpush3.bf16.msra.mxu0 %v3572_v26 }
 0x8dc   :  { %3105 = vmatprep.subr.bf16.mxu1 %v3571_v30  ;;  %3362 = vmatprep.subr.bf16.mxu0 %v3575_v32 }
 0x8df   :  { %3106 = vmatpush3.bf16.msra.mxu1 %v3573_v34  ;;  %3363 = vmatpush3.bf16.msra.mxu0 %v3575_v32 }
 0x8e0   :  { %3107 = vmatprep.subr.bf16.mxu1 %v3574_v36  ;;  %3364 = vmatprep.subr.bf16.mxu0 %v3578_v37 }
 0x8e3   :  { %3108 = vmatpush3.bf16.msra.mxu1 %v3576_v38  ;;  %3365 = vmatpush3.bf16.msra.mxu0 %v3578_v37  ;;  %v2902_v38 = vld [vmem:[%s4096_s9 + $0x1] ss:$0 sm:$0xff] }
 0x8e4   :  { %3109 = vmatprep.subr.bf16.mxu1 %v3577_v39  ;;  %3366 = vmatprep.subr.bf16.mxu0 %v3581_v41 }
 0x8e7   :  { %3110 = vmatpush3.bf16.msra.mxu1 %v3579_v42  ;;  %3367 = vmatpush3.bf16.msra.mxu0 %v3581_v41 }
 0x8e8   :  { %3111 = vmatprep.subr.bf16.mxu1 %v3580_v43  ;;  %3368 = vmatprep.subr.bf16.mxu0 %v3584_v33 }
 0x8eb   :  { %3112 = vmatpush3.bf16.msra.mxu1 %v3582_v44  ;;  %3369 = vmatpush3.bf16.msra.mxu0 %v3584_v33 }
 0x8ec   :  { %3113 = vmatprep.subr.bf16.mxu1 %v3583_v45  ;;  %3370 = vmatprep.subr.bf16.mxu0 %v3587_v48 }
 0x8ef   :  { %3114 = vmatpush3.bf16.msra.mxu1 %v3585_v46  ;;  %3371 = vmatpush3.bf16.msra.mxu0 %v3587_v48 }
 0x8f0   :  { %3115 = vmatprep.subr.bf16.mxu1 %v3586_v47  ;;  %3372 = vmatprep.subr.bf16.mxu0 %v3589_v50 }
 0x8f3   :  { %3116 = vmatpush3.bf16.msra.mxu1 %v3588_v49  ;;  %3373 = vmatpush3.bf16.msra.mxu0 %v3589_v50 }
 0x8f4   :  { %3398 = vmatprep.subr.bf16.mxu0 %v3750_v19  ;;  %3378 = vmatprep.subr.bf16.mxu1 %v3590_v51 }
 0x8f6   :  { %3375 = vmatmul.mubr.bf16.vlgmr.msra.gmra.mrb[32].mxu0 %v3903_v35  ;;  %v3592_v35 = vld [vmem:[#allocation5 + $0x50] sm:$0xff]  }
 0x8f7   :  { %3402 = vmatprep.mubr.msk.bf16.mxu0 %vm3751_vm2, %v3750_v19 }
 0x9a9   :  { %v3350_v52 = vpop.f32.mrb[32].mxu1  ;;  %v3356_v53 = vpop.f32.mrb[28].mxu0 }
 0x9aa   :  { %v1481_v54 = vpop.f32.mrb[33].mxu1  ;;  %v1531_v55 = vpop.f32.mrb[29].mxu0  ;;  %v1546_v63 = vpack.c.bf16 %v3356_v53, %v3356_v53  ;;  %v1496_v0 = vpack.c.bf16 %v3350_v52, %v3350_v52 }
 0x9ab   :  { %v3351_v56 = vpop.f32.mrb[34].mxu1  ;;  %v3357_v57 = vpop.f32.mrb[30].mxu0 }
 0x9ac   :  { %v1484_v58 = vpop.f32.mrb[35].mxu1  ;;  %v1534_v59 = vpop.f32.mrb[31].mxu0  ;;  %v3617_v56 = vld [vmem:[#allocation7 + $0x218] sm:$0xff]   ;;  %v3618_v57 = vld [vmem:[#allocation7 + $0x220] sm:$0xff]  }
 0x9ad   :  { %v1495_v60 = vpack.c.bf16 %v1484_v58, %v1481_v54  ;;  %v1545_v61 = vpack.c.bf16 %v1534_v59, %v1531_v55  ;;  %v3615_v54 = vld [vmem:[#allocation7 + $0x208] sm:$0xff]   ;;  %v3616_v55 = vld [vmem:[#allocation7 + $0x210] sm:$0xff]  }
 0x9ae   :  { %v3619_v58 = vld [vmem:[#allocation7 + $0x228] sm:$0xff]   ;;  %v3620_v59 = vld [vmem:[#allocation7 + $0x230] sm:$0xff]  }
 0x9af   :  { %1780 = vmatprep.mubr.bf16.mxu1 %v1545_v61 }
 0x9b0   :  { %1781 = vmatmul.mubr.bf16.vlgmr.msra.gmra.mrb[36].mxu1 %v1495_v60 }
 0x9b1   :  { %1788 = vmatprep.mubr.bf16.mxu1 %v1546_v63  ;;  %3379 = vmatpush3.bf16.msra.mxu1 %v3590_v51  ;;  %v3598_v63 = vld [vmem:[#allocation7 + $0x1c0] sm:$0xff]  }
 0x9b2   :  { %3380 = vmatprep.subr.bf16.mxu1 %v3591_v62 }
 0x9b5   :  { %3381 = vmatpush3.bf16.msra.mxu1 %v3591_v62 }
 0x9b6   :  { %3382 = vmatprep.subr.bf16.mxu1 %v3592_v35 }
 0x9b8   :  { %1789 = vmatmul.mubr.bf16.gmra.mrb[40].mxu1 %v1496_v0 }
 0x9b9   :  { %3383 = vmatpush3.bf16.msra.mxu1 %v3592_v35 }
 0x9ba   :  { %3384 = vmatprep.subr.bf16.mxu1 %v3593_v1 }
 0x9bd   :  { %3385 = vmatpush3.bf16.msra.mxu1 %v3593_v1 }
 0x9be   :  { %3386 = vmatprep.subr.bf16.mxu1 %v3594_v2 }
 0x9c1   :  { %3387 = vmatpush3.bf16.msra.mxu1 %v3594_v2  ;;  %v3599_v2 = vld [vmem:[#allocation7 + $0x180] sm:$0xff]  }
 0x9c2   :  { %3388 = vmatprep.subr.bf16.mxu1 %v3595_v6 }
 0x9c5   :  { %3389 = vmatpush3.bf16.msra.mxu1 %v3595_v6  ;;  %v3603_v6 = vld [vmem:[#allocation7 + $0x190] sm:$0xff]  }
 0x9c6   :  { %3390 = vmatprep.subr.bf16.mxu1 %v3596_v8 }
 0x9c9   :  { %v3376_v3 = vpop.f32.mrb[32].mxu0  ;;  %3391 = vmatpush3.bf16.msra.mxu1 %v3596_v8  ;;  %v3605_v8 = vld [vmem:[#allocation7 + $0x198] sm:$0xff]  }
 0x9ca   :  { %v1830_v4 = vpop.f32.mrb[33].mxu0  ;;  %3392 = vmatprep.subr.bf16.mxu1 %v3597_v9 }
 0x9cb   :  { %v3377_v5 = vpop.f32.mrb[34].mxu0 }
 0x9cc   :  { %v1833_v7 = vpop.f32.mrb[35].mxu0  ;;  %v3602_v5 = vld [vmem:[#allocation7 + $0x1d0] sm:$0xff]  }
 0x9cd   :  { %3393 = vmatpush3.bf16.msra.mxu1 %v3597_v9  ;;  %v3606_v9 = vld [vmem:[#allocation7 + $0x1e0] sm:$0xff]  }
 0x9ce   :  { %3418 = vmatprep.subr.bf16.mxu1 %v3750_v19 }
 0xa83   :  { %v3117_v10 = vpop.f32.mrb[36].mxu1 }
 0xa84   :  { %v3118_v11 = vpop.f32.mrb[37].mxu1 }
 0xa85   :  { %v3119_v13 = vadd.f32 %v3118_v11, %v3117_v10  ;;  %v3120_v14 = vpop.f32.mrb[38].mxu1  ;;  %v3607_v10 = vld [vmem:[#allocation7 + $0x1a0] sm:$0xff]   ;;  %v3608_v11 = vld [vmem:[#allocation7 + $0x1e8] sm:$0xff]  }
 0xa86   :  { %v3121_v15 = vpop.f32.mrb[39].mxu1 }
 0xa87   :  { %v3122_v16 = vadd.f32 %v3121_v15, %v3120_v14  ;;  %v1783_v17 = vadd.f32 %v3119_v13, %v2876_v12  ;;  %v3610_v13 = vld [vmem:[#allocation7 + $0x1f0] sm:$0xff]   ;;  %v3612_v15 = vld [vmem:[#allocation7 + $0x1f8] sm:$0xff]  }
 0xa88   :  { %v3611_v14 = vld [vmem:[#allocation7 + $0x1b0] sm:$0xff]  }
 0xa89   :  { %v1831_v18 = vadd.f32 %v1830_v4, %v1783_v17  ;;  %v1786_v20 = vadd.f32 %v3122_v16, %v2876_v12  ;;  %v3601_v4 = vld [vmem:[#allocation7 + $0x188] sm:$0xff]   ;;  %v3613_v16 = vld [vmem:[#allocation7 + $0x1b8] sm:$0xff]  }
 0xa8a   :  { %v3621_v17 = vld [vmem:[#allocation7 + $0x238] sm:$0xff]  }
 0xa8b   :  { %v1834_v21 = vadd.f32 %v1833_v7, %v1786_v20  ;;  %v3123_v22 = vpop.f32.mrb[40].mxu1  ;;  %v1844_v24 = vmax.f32 %v1831_v18, 0.0  ;;  %v3604_v7 = vld [vmem:[#allocation7 + $0x1d8] sm:$0xff]  }
 0xa8c   :  { %v3124_v23 = vpop.f32.mrb[41].mxu1 }
 0xa8d   :  { %v1845_v25 = vmax.f32 %v1834_v21, 0.0  ;;  %v3125_v26 = vadd.f32 %v3124_v23, %v3123_v22  ;;  %v3126_v27 = vpop.f32.mrb[42].mxu1 }
 0xa8e   :  { %v3127_v28 = vpop.f32.mrb[43].mxu1 }
 0xa8f   :  { %v1847_v29 = vpack.c.bf16 %v1845_v25, %v1844_v24  ;;  %v1791_v30 = vadd.f32 %v3125_v26, %v2876_v12  ;;  %v3609_v12 = vld [vmem:[#allocation7 + $0x1a8] sm:$0xff]  }
 0xa91   :  { %v1839_v32 = vadd.f32 %v3376_v3, %v1791_v30  ;;  %3394 = vmatprep.mubr.bf16.mxu1 %v1847_v29  ;;  %v3600_v3 = vld [vmem:[#allocation7 + $0x1c8] sm:$0xff]   ;;  %v2915_v29 = vld [vmem:[%s4098_s11 + $0x2] ss:$0 sm:$0xff] }
 0xa93   :  { %v1846_v34 = vmax.f32 %v1839_v32, 0.0 }
 0xa95   :  { %v1848_v36 = vpack.c.bf16 %v1846_v34, %v1846_v34 }
 0xa97   :  { %3395 = vmatmul.mubr.bf16.vlgmr.msra.gmra.mrb[44].mxu1 %v1848_v36 }
 0xa98   :  { %3434 = vmatprep.mubr.msk.bf16.mxu1 %vm3751_vm2, %v3750_v19 }
 0xb6a   :  { %v3396_v37 = vpop.f32.mrb[44].mxu1 }
 0xb6b   :  { %v1956_v39 = vpop.f32.mrb[45].mxu1  ;;  %v1965_v42 = vadd.f32 %v3396_v37, %v2902_v38 }
 0xb6c   :  { %v3397_v41 = vpop.f32.mrb[46].mxu1  ;;  %v1957_v33 = vadd.f32 %v2902_v38, %v1956_v39 }
 0xb6d   :  { %v1959_v43 = vpop.f32.mrb[47].mxu1  ;;  %v1971_v46 = vpack.c.bf16 %v1965_v42, %v1965_v42  ;;  %v3622_v42 = vld [vmem:[#allocation7 + $0x280] sm:$0xff]  }
 0xb6e   :  { %v1960_v44 = vadd.f32 %v2902_v38, %v1959_v43 }
 0xb6f   :  { %v1973_v47 = vsel %vm114_vm0, %v1971_v46, 0  ;;  %v3626_v46 = vld [vmem:[#allocation7 + $0x290] sm:$0xff]  }
 0xb70   :  { %v1970_v45 = vpack.c.bf16 %v1960_v44, %v1957_v33  ;;  %v3623_v33 = vld [vmem:[#allocation7 + $0x240] sm:$0xff]   ;;  %v3624_v44 = vld [vmem:[#allocation7 + $0x288] sm:$0xff]  }
 0xb72   :  { %3399 = vmatpush3.bf16.msra.mxu0 %v1970_v45  ;;  %v3625_v45 = vld [vmem:[#allocation7 + $0x248] sm:$0xff]  }
 0xb73   :  { %3400 = vmatprep.subr.bf16.mxu0 %v3750_v19 }
 0xb76   :  { %3401 = vmatpush3.bf16.msra.mxu0 %v1973_v47  ;;  %v3627_v47 = vld [vmem:[#allocation7 + $0x250] sm:$0xff]  }
 0xb77   :  { %3406 = vmatprep.subr.bf16.mxu0 %v3750_v19 }
 0xb79   :  { %3403 = vmatmul.mubr.msk.bf16.vlgmr.msra.gmra.mrb[36].mxu0 %vm653_vm3, %v3924_v31  ;;  %v3614_v31 = vld [vmem:[#allocation7 + $0x200] sm:$0xff]  }
 0xb7a   :  { %3408 = vmatprep.mubr.msk.bf16.mxu0 %vm3751_vm2, %v3750_v19  ;;  %3419 = vmatpush3.bf16.msra.mxu1 %v3614_v31  ;;  %v3634_v31 = vld [vmem:[#allocation7 + $0x2b0] sm:$0xff]  }
 0xb7b   :  { %3420 = vmatprep.subr.bf16.mxu1 %v3750_v19 }
 0xb7e   :  { %3421 = vmatpush3.bf16.msra.mxu1 %v3615_v54  ;;  %v3635_v54 = vld [vmem:[#allocation7 + $0x270] sm:$0xff]  }
 0xb7f   :  { %3422 = vmatprep.subr.bf16.mxu1 %v3750_v19 }
 0xb82   :  { %3423 = vmatpush3.bf16.msra.mxu1 %v3616_v55  ;;  %v3636_v55 = vld [vmem:[#allocation7 + $0x2b8] sm:$0xff]  }
 0xb83   :  { %3424 = vmatprep.subr.bf16.mxu1 %v3750_v19 }
 0xb86   :  { %3425 = vmatpush3.bf16.msra.mxu1 %v3617_v56  ;;  %v3637_v56 = vld [vmem:[#allocation7 + $0x278] sm:$0xff]  }
 0xb87   :  { %3426 = vmatprep.subr.bf16.mxu1 %v3750_v19 }
 0xb8a   :  { %3427 = vmatpush3.bf16.msra.mxu1 %v3618_v57 }
 0xb8b   :  { %3428 = vmatprep.subr.bf16.mxu1 %v3750_v19 }
 0xb8e   :  { %3429 = vmatpush3.bf16.msra.mxu1 %v3619_v58 }
 0xb8f   :  { %3430 = vmatprep.subr.bf16.mxu1 %v3750_v19 }
 0xb92   :  { %3431 = vmatpush3.bf16.msra.mxu1 %v3620_v59 }
 0xb93   :  { %3432 = vmatprep.subr.bf16.mxu1 %v3750_v19 }
 0xb96   :  { %3433 = vmatpush3.bf16.msra.mxu1 %v3621_v17 }
 0xb97   :  { %3444 = vmatprep.subr.bf16.mxu1 %v3750_v19 }
 0xc4c   :  { %v2009_v48 = vpop.f32.mrb[36].mxu0 }
 0xc4d   :  { %v4027_v49 = vpack.c.bf16 %v2009_v48, %v2009_v48  ;;  %v3404_v50 = vpop.f32.mrb[37].mxu0  ;;  %v3628_v48 = vld [vmem:[#allocation7 + $0x298] sm:$0xff]  }
 0xc4e   :  { %v2012_v51 = vpop.f32.mrb[38].mxu0  ;;  %v3630_v50 = vld [vmem:[#allocation7 + $0x2a0] sm:$0xff]  }
 0xc4f   :  { %v2017_v52 = vsel %vm114_vm0, %v4027_v49, 0  ;;  %v3405_v53 = vpop.f32.mrb[39].mxu0  ;;  %v3631_v51 = vld [vmem:[#allocation7 + $0x260] sm:$0xff]  }
 0xc50   :  { %3407 = vmatpush3.bf16.msra.mxu0 %v2017_v52  ;;  %v3632_v52 = vld [vmem:[#allocation7 + $0x2a8] sm:$0xff]  }
 0xc51   :  { %3412 = vmatprep.subr.bf16.mxu0 %v3750_v19  ;;  %v3633_v53 = vld [vmem:[#allocation7 + $0x268] sm:$0xff]  }
 0xc53   :  { %3409 = vmatmul.mubr.msk.bf16.vlgmr.msra.gmra.mrb[40].mxu0 %vm107_vm1, %v3938_v40 }
 0xc54   :  { %3414 = vmatprep.mubr.msk.bf16.mxu0 %vm3751_vm2, %v3750_v19 }
 0xd26   :  { %v2053_v60 = vpop.f32.mrb[40].mxu0 }
 0xd27   :  { %v2059_v61 = vpack.c.bf16 %v2053_v60, %v2053_v60  ;;  %v3410_v62 = vpop.f32.mrb[41].mxu0 }
 0xd28   :  { %v2056_v35 = vpop.f32.mrb[42].mxu0 }
 0xd29   :  { %v2061_v0 = vsel %vm114_vm0, %v2059_v61, 0  ;;  %v3411_v1 = vpop.f32.mrb[43].mxu0  ;;  %v3639_v35 = vld [vmem:[#allocation7 + $0x2c8] sm:$0xff]  }
 0xd2a   :  { %3413 = vmatpush3.bf16.msra.mxu0 %v2061_v0  ;;  %v3640_v0 = vld [vmem:[#allocation7 + $0x2d0] sm:$0xff]   ;;  %v3641_v1 = vld [vmem:[#allocation7 + $0x2d8] sm:$0xff]  }
 0xd2b   :  { %3156 = vmatprep.subr.bf16.mxu0 %v3598_v63  ;;  %v3638_v63 = vld [vmem:[#allocation7 + $0x2c0] sm:$0xff]  }
 0xd2d   :  { %3415 = vmatmul.mubr.msk.bf16.vlgmr.msra.gmra.mrb[44].mxu0 %vm107_vm1, %v3938_v40 }
 0xd2e   :  { %3157 = vmatpush3.bf16.msra.mxu0 %v3599_v2  ;;  %2337 = vmatprep.mubr.bf16.mxu0 %v2059_v61  ;;  %v3642_v2 = vld [vmem:[#allocation7 + $0x2e0] sm:$0xff]  }
 0xd2f   :  { %3158 = vmatprep.subr.bf16.mxu0 %v3600_v3  ;;  %v3644_v3 = vld [vmem:[#allocation7 + $0x2f0] sm:$0xff]  }
 0xd32   :  { %3159 = vmatpush3.bf16.msra.mxu0 %v3601_v4  ;;  %v3645_v4 = vld [vmem:[#allocation7 + $0x2f8] sm:$0xff]  }
 0xd33   :  { %3160 = vmatprep.subr.bf16.mxu0 %v3602_v5 }
 0xd36   :  { %3161 = vmatpush3.bf16.msra.mxu0 %v3603_v6 }
 0xd37   :  { %3162 = vmatprep.subr.bf16.mxu0 %v3604_v7 }
 0xd3a   :  { %3163 = vmatpush3.bf16.msra.mxu0 %v3605_v8 }
 0xd3b   :  { %3164 = vmatprep.subr.bf16.mxu0 %v3606_v9 }
 0xd3e   :  { %3165 = vmatpush3.bf16.msra.mxu0 %v3607_v10 }
 0xd3f   :  { %3166 = vmatprep.subr.bf16.mxu0 %v3608_v11 }
 0xd42   :  { %3167 = vmatpush3.bf16.msra.mxu0 %v3609_v12 }
 0xd43   :  { %3168 = vmatprep.subr.bf16.mxu0 %v3610_v13 }
 0xd46   :  { %3169 = vmatpush3.bf16.msra.mxu0 %v3611_v14 }
 0xd47   :  { %3170 = vmatprep.subr.bf16.mxu0 %v3612_v15  ;;  %v2943_v15 = vld [vmem:[%s4098_s11 + $0x3] ss:$0 sm:$0xff] }
 0xd4a   :  { %3171 = vmatpush3.bf16.msra.mxu0 %v3613_v16 }
 0xd4b   :  { %3438 = vmatprep.subr.bf16.mxu0 %v3750_v19 }
 0xd4d   :  { %2338 = vmatmul.mubr.bf16.vlgmr.msra.gmra.mrb[48].mxu0 %v4027_v49  ;;  %v3629_v49 = vld [vmem:[#allocation7 + $0x258] sm:$0xff]  }
 0xd4e   :  { %3440 = vmatprep.mubr.msk.bf16.mxu0 %vm3751_vm2, %v3750_v19 }
 0xe00   :  { %v2097_v18 = vpop.f32.mrb[44].mxu0 }
 0xe01   :  { %v2103_v20 = vpack.c.bf16 %v2097_v18, %v2097_v18  ;;  %v3416_v21 = vpop.f32.mrb[45].mxu0 }
 0xe02   :  { %v2100_v22 = vpop.f32.mrb[46].mxu0 }
 0xe03   :  { %v3417_v23 = vpop.f32.mrb[47].mxu0  ;;  %3435 = vmatmul.mubr.bf16.vlgmr.msra.gmra.mrb[48].mxu1 %v2103_v20 }
 0xe04   :  { %3446 = vmatprep.mubr.msk.bf16.mxu1 %vm3751_vm2, %v3750_v19 }
 0xe20   :  { %v3172_v24 = vpop.f32.mrb[48].mxu0 }
 0xe21   :  { %v3173_v25 = vpop.f32.mrb[49].mxu0 }
 0xe22   :  { %v3174_v26 = vadd.f32 %v3173_v25, %v3172_v24  ;;  %v3175_v27 = vpop.f32.mrb[50].mxu0 }
 0xe23   :  { %v3176_v28 = vpop.f32.mrb[51].mxu0 }
 0xe24   :  { %v2340_v30 = vadd.f32 %v3174_v26, %v2915_v29 }
 0xed6   :  { %v2379_v32 = vpop.f32.mrb[48].mxu1 }
 0xed7   :  { %v2380_v34 = vadd.f32 %v2379_v32, %v2340_v30  ;;  %v3436_v36 = vpop.f32.mrb[49].mxu1 }
 0xed8   :  { %v2382_v37 = vpop.f32.mrb[50].mxu1 }
 0xed9   :  { %v2385_v38 = vmax.f32 %v2380_v34, 0.0  ;;  %v3437_v39 = vpop.f32.mrb[51].mxu1 }
 0xedb   :  { %v2386_v41 = vpack.c.bf16 %v2385_v38, %v2385_v38 }
 0xedd   :  { %v2388_v43 = vsel %vm114_vm0, %v2386_v41, 0 }
 0xede   :  { %3439 = vmatpush3.bf16.msra.mxu0 %v2388_v43 }
 0xedf   :  { %3191 = vmatprep.subr.bf16.mxu0 %v3622_v42 }
 0xee1   :  { %3441 = vmatmul.mubr.msk.bf16.vlgmr.msra.gmra.mrb[52].mxu0 %vm107_vm1, %v3938_v40 }
 0xee2   :  { %3192 = vmatpush3.bf16.msra.mxu0 %v3623_v33 }
 0xee3   :  { %3193 = vmatprep.subr.bf16.mxu0 %v3624_v44 }
 0xee6   :  { %3194 = vmatpush3.bf16.msra.mxu0 %v3625_v45 }
 0xee7   :  { %3195 = vmatprep.subr.bf16.mxu0 %v3626_v46 }
 0xeea   :  { %3196 = vmatpush3.bf16.msra.mxu0 %v3627_v47 }
 0xeeb   :  { %3197 = vmatprep.subr.bf16.mxu0 %v3628_v48 }
 0xeee   :  { %3198 = vmatpush3.bf16.msra.mxu0 %v3629_v49 }
 0xeef   :  { %3199 = vmatprep.subr.bf16.mxu0 %v3630_v50 }
 0xef2   :  { %3200 = vmatpush3.bf16.msra.mxu0 %v3631_v51 }
 0xef3   :  { %3201 = vmatprep.subr.bf16.mxu0 %v3632_v52 }
 0xef6   :  { %3202 = vmatpush3.bf16.msra.mxu0 %v3633_v53 }
 0xef7   :  { %3203 = vmatprep.subr.bf16.mxu0 %v3634_v31 }
 0xefa   :  { %3204 = vmatpush3.bf16.msra.mxu0 %v3635_v54 }
 0xefb   :  { %3205 = vmatprep.subr.bf16.mxu0 %v3636_v55 }
 0xefe   :  { %3206 = vmatpush3.bf16.msra.mxu0 %v3637_v56 }
 0xfb4   :  { %v2424_v57 = vpop.f32.mrb[52].mxu0 }
 0xfb5   :  { %v2430_v58 = vpack.c.bf16 %v2424_v57, %v2424_v57  ;;  %v3442_v59 = vpop.f32.mrb[53].mxu0 }
 0xfb6   :  { %v2427_v60 = vpop.f32.mrb[54].mxu0 }
 0xfb7   :  { %v2432_v61 = vsel %vm114_vm0, %v2430_v58, 0  ;;  %v3443_v62 = vpop.f32.mrb[55].mxu0  ;;  %2708 = vmatprep.mubr.bf16.mxu0 %v2430_v58 }
 0xfb8   :  { %3445 = vmatpush3.bf16.msra.mxu1 %v2432_v61  ;;  %2709 = vmatmul.mubr.bf16.vlgmr.msra.gmra.mrb[56].mxu0 %v2386_v41 }
 0xfb9   :  { %3450 = vmatprep.subr.bf16.mxu1 %v3750_v19 }
 0xfbb   :  { %3447 = vmatmul.mubr.msk.bf16.vlgmr.msra.gmra.mrb[52].mxu1 %vm107_vm1, %v3938_v40  ;;  %v3643_v40 = vld [vmem:[#allocation7 + $0x2e8] sm:$0xff]  }
 0xfbc   :  { %3451 = vmatpush3.bf16.msra.mxu1 %v3638_v63  ;;  %3466 = vmatprep.mubr.msk.bf16.mxu1 %vm3751_vm2, %v3750_v19 }
 0xfbd   :  { %3452 = vmatprep.subr.bf16.mxu1 %v3750_v19 }
 0xfc0   :  { %3453 = vmatpush3.bf16.msra.mxu1 %v3639_v35 }
 0xfc1   :  { %3454 = vmatprep.subr.bf16.mxu1 %v3750_v19 }
 0xfc4   :  { %3455 = vmatpush3.bf16.msra.mxu1 %v3640_v0 }
 0xfc5   :  { %3456 = vmatprep.subr.bf16.mxu1 %v3750_v19 }
 0xfc8   :  { %3457 = vmatpush3.bf16.msra.mxu1 %v3641_v1 }
 0xfc9   :  { %3458 = vmatprep.subr.bf16.mxu1 %v3750_v19 }
 0xfcc   :  { %3459 = vmatpush3.bf16.msra.mxu1 %v3642_v2 }
 0xfcd   :  { %3460 = vmatprep.subr.bf16.mxu1 %v3750_v19 }
 0xfd0   :  { %3461 = vmatpush3.bf16.msra.mxu1 %v3643_v40 }
 0xfd1   :  { %3462 = vmatprep.subr.bf16.mxu1 %v3750_v19 }
 0xfd4   :  { %3463 = vmatpush3.bf16.msra.mxu1 %v3644_v3 }
 0xfd5   :  { %3464 = vmatprep.subr.bf16.mxu1 %v3750_v19 }
 0xfd8   :  { %3465 = vmatpush3.bf16.msra.mxu1 %v3645_v4 }
0x108b   :  { %v3207_v5 = vpop.f32.mrb[56].mxu0 }
0x108c   :  { %v3208_v6 = vpop.f32.mrb[57].mxu0 }
0x108d   :  { %v3209_v7 = vadd.f32 %v3208_v6, %v3207_v5  ;;  %v3210_v8 = vpop.f32.mrb[58].mxu0 }
0x108e   :  { %v2468_v9 = vpop.f32.mrb[52].mxu1  ;;  %v3211_v10 = vpop.f32.mrb[59].mxu0 }
0x108f   :  { %v2474_v11 = vpack.c.bf16 %v2468_v9, %v2468_v9  ;;  %v3448_v12 = vpop.f32.mrb[53].mxu1  ;;  %v2711_v19 = vadd.f32 %v3209_v7, %v2943_v15 }
0x1090   :  { %v2471_v13 = vpop.f32.mrb[54].mxu1 }
0x1091   :  { %3467 = vmatmul.mubr.bf16.vlgmr.msra.gmra.mrb[56].mxu1 %v2474_v11  ;;  %v3449_v14 = vpop.f32.mrb[55].mxu1 }
0x1164   :  { %v2750_v16 = vpop.f32.mrb[56].mxu1 }
0x1165   :  { %v2751_v17 = vadd.f32 %v2750_v16, %v2711_v19  ;;  %v3468_v18 = vpop.f32.mrb[57].mxu1 }
0x1166   :  { %v2753_v20 = vpop.f32.mrb[58].mxu1 }
0x1167   :  { %2756 = vst [vmem:[#allocation8] sm:$0xff] %v2751_v17  ;;  %v3469_v21 = vpop.f32.mrb[59].mxu1 }
0x1168   :  { %3728 = shalt.err (!%p3725_p0)
}
0x1169   :  { %s3729_s11 = scalar_lea.hbm %s4099_s12, 128 }
0x116a   :  { %p3730_p1 = scmp.ne.s32.totalorder %s4099_s12, %s3729_s11  ;;  %p3733_p2 = scmp.lt.u32.totalorder %s3729_s11, %s4099_s12 }
0x116c   :  { %p3735_p3 = pnand %p3733_p2, %p3730_p1 }
0x116e   :  { %3738 = shalt.err (!%p3735_p3)
}
0x116f   :  { %2766 = dma.vmem_to_hbm [thread:$0]  %s2764_s21, 128, %s4099_s12, [#allocation4]  }
0x1170   :  { %3743 = dma.done.wait [#allocation4], 128  }
0x1171   :  { %3744 = vsyncadd [#allocation4], 4294967168 }
0x1172   :  { %2770 = vsyncpa [#allocation3], 1 }
0x1173   :  { %2771 = vsyncpa [#allocation6], 1 }
0x1174   :  { %2772 = vsyncpa [#allocation4], 1 }

</bundles_post_ra>
